<compile_context>
chip_gen: v7x
topology: tpu7x:2x2x1
jax: 0.10.0
libtpu: 0.0.40
codegen_flags: <defaults>
</compile_context>

<pallas_src>
import functools

import jax
import jax.numpy as jnp
import numpy as np
from jax.experimental import pallas as pl
from jax.experimental.pallas import tpu as pltpu

# ----------------------------- model config ---------------------------------
BS = 2
T_STEPS = 3
N_AGENTS = 2
IMG_H, IMG_W, IMG_C = 16, 16, 3          # gray_scale = False -> C = 3
CNN1_OUT, CNN1_K, CNN1_S = 8, 4, 2
CNN2_OUT, CNN2_K, CNN2_S = 16, 3, 1
MLP_SIZE = 32
RNN_SIZE = 32
OPRE_N_BINS = 8
IS_Q = True
NON_RGB_KEYS = ["READY_TO_SHOOT"]        # one scalar non-RGB obs per agent
NON_RGB_SHAPES = 1                       # sum of flattened non-RGB obs dims


def _conv_out(in_size, k, s, p=0):
    return (in_size + 2 * p - k) // s + 1


H1, W1 = _conv_out(IMG_H, CNN1_K, CNN1_S), _conv_out(IMG_W, CNN1_K, CNN1_S)
H2, W2 = _conv_out(H1, CNN2_K, CNN2_S), _conv_out(W1, CNN2_K, CNN2_S)
D0 = IMG_C * IMG_H * IMG_W                                    # 768
D1 = H1 * W1 * CNN1_OUT                                       # 392
FC1_IN = CNN2_OUT * H2 * W2                                   # 400
FC3_IN = (NON_RGB_SHAPES + MLP_SIZE + RNN_SIZE) * (N_AGENTS if IS_Q else 1)  # 130


# ----------------------------- parameters ------------------------------------
# Stored in PyTorch-canonical shapes; prepare_params derives the kernel layout.

def init_params(key):
    ks = jax.random.split(key, 10)

    def w(k, shape, scale):
        return jax.random.normal(k, shape, jnp.float32) * scale

    return {
        "conv1_w": w(ks[0], (CNN1_OUT, IMG_C, CNN1_K, CNN1_K), 0.05),
        "conv1_b": w(ks[1], (CNN1_OUT,), 0.01),
        "conv2_w": w(ks[2], (CNN2_OUT, CNN1_OUT, CNN2_K, CNN2_K), 0.05),
        "conv2_b": w(ks[3], (CNN2_OUT,), 0.01),
        "fc1_w":   w(ks[4], (MLP_SIZE, FC1_IN), 0.02),
        "fc1_b":   w(ks[5], (MLP_SIZE,), 0.01),
        "fc2_w":   w(ks[6], (MLP_SIZE, MLP_SIZE), 0.05),
        "fc2_b":   w(ks[7], (MLP_SIZE,), 0.01),
        "fc3_w":   w(ks[8], (OPRE_N_BINS, FC3_IN), 0.05),
        "fc3_b":   w(ks[9], (OPRE_N_BINS,), 0.01),
    }


def prepare_params(p):
    """One-time conversion of canonical PyTorch weights into kernel layout.

    * conv1/conv2 are expanded into block-sparse dense matmul matrices acting
      on per-sample rows:
        - W1x: (768, 392), maps the flat (C,H,W)-reinterpreted image to the
          full conv1 output in (h1, w1, c1) column order; /255 folded in.
        - W2x: (392, 400), maps the conv1 output to the full conv2 output in
          PyTorch (c2, h2, w2) flatten order, so fc1's weight is used as-is.
    * fc1/fc2/fc3 weights packed into one 32-lane bf16 slab (fc3 col-padded).
    * all biases packed into one small f32 slab.
    """
    conv1_w = np.asarray(p["conv1_w"], np.float32)
    conv1_b = np.asarray(p["conv1_b"], np.float32)
    conv2_w = np.asarray(p["conv2_w"], np.float32)
    conv2_b = np.asarray(p["conv2_b"], np.float32)
    fc1_w = np.asarray(p["fc1_w"], np.float32)
    fc1_b = np.asarray(p["fc1_b"], np.float32)
    fc2_w = np.asarray(p["fc2_w"], np.float32)
    fc2_b = np.asarray(p["fc2_b"], np.float32)
    fc3_w = np.asarray(p["fc3_w"], np.float32)
    fc3_b = np.asarray(p["fc3_b"], np.float32)

    # conv1 expanded: rows = flat (ci, h, w) image index, cols = (h1, w1, c1).
    w1x = np.zeros((D0, D1), np.float32)
    for h1 in range(H1):
        for w1 in range(W1):
            for c1 in range(CNN1_OUT):
                col = (h1 * W1 + w1) * CNN1_OUT + c1
                for ci in range(IMG_C):
                    for ki in range(CNN1_K):
                        for kj in range(CNN1_K):
                            row = (ci * IMG_H + h1 * CNN1_S + ki) * IMG_W \
                                  + (w1 * CNN1_S + kj)
                            w1x[row, col] = conv1_w[c1, ci, ki, kj]
    w1x *= (1.0 / 255.0)                 # fold the /255 image scaling in

    # conv2 expanded: rows = (h1, w1, c1), cols = PyTorch flatten (c2, h2, w2).
    w2x = np.zeros((D1, FC1_IN), np.float32)
    for c2 in range(CNN2_OUT):
        for h2 in range(H2):
            for w2 in range(W2):
                col = (c2 * H2 + h2) * W2 + w2
                for c1 in range(CNN1_OUT):
                    for ki in range(CNN2_K):
                        for kj in range(CNN2_K):
                            row = ((h2 * CNN2_S + ki) * W1
                                   + (w2 * CNN2_S + kj)) * CNN1_OUT + c1
                            w2x[row, col] = conv2_w[c2, c1, ki, kj]

    # small-weight slab (bf16, 32 lanes): fc1 | fc2 | fc3 (col-padded 8 -> 32)
    sw = np.zeros((FC1_IN + MLP_SIZE + FC3_IN, MLP_SIZE), np.float32)
    sw[:FC1_IN] = fc1_w.T
    sw[FC1_IN:FC1_IN + MLP_SIZE] = fc2_w.T
    sw[FC1_IN + MLP_SIZE:, :OPRE_N_BINS] = fc3_w.T

    # bias slab (f32): [conv1 tiled, conv2 tiled, fc1, fc2, fc3]
    bias = np.zeros((5, FC1_IN), np.float32)
    bias[0, :D1] = np.tile(conv1_b, H1 * W1)          # (h1, w1, c1) order
    bias[1, :FC1_IN] = np.repeat(conv2_b, H2 * W2)    # (c2, h2, w2) order
    bias[2, :MLP_SIZE] = fc1_b
    bias[3, :MLP_SIZE] = fc2_b
    bias[4, :OPRE_N_BINS] = fc3_b

    return {
        "w1x": jnp.asarray(w1x, jnp.bfloat16),
        "w2x": jnp.asarray(w2x, jnp.bfloat16),
        "sw": jnp.asarray(sw, jnp.bfloat16),
        "bias": jnp.asarray(bias, jnp.float32),
    }


# ------------------------------ fused kernel ---------------------------------

def _opre_fused_kernel(img_ref, w1x_ref, w2x_ref, sw_ref, bias_ref, extra_ref,
                       z_ref, prob_ref, x2_scr, *, bs, n_agents, d1, d2, mlp,
                       n_bins, n_extra):
    f32 = jnp.float32

    # ---- conv1 (expanded matmul): (ns,768)@(768,392); /255 already folded in.
    y1 = jnp.dot(img_ref[...], w1x_ref[...], preferred_element_type=f32)
    y1 = jnp.maximum(y1 + bias_ref[0:1, :d1], 0.0)            # (ns, 392) f32

    # ---- conv2 (expanded matmul): (ns,392)@(392,400), PyTorch flatten order.
    x = jnp.dot(y1.astype(jnp.bfloat16), w2x_ref[...], preferred_element_type=f32)
    x = jnp.maximum(x + bias_ref[1:2, :d2], 0.0)              # (ns, 400) f32

    # ---- fc1: (ns,400)@(400,32)
    x = jnp.dot(x.astype(jnp.bfloat16), sw_ref[0:d2, :], preferred_element_type=f32)
    x = jnp.maximum(x + bias_ref[2:3, :mlp], 0.0)             # (ns, 32) f32

    # ---- fc2: (ns,32)@(32,32)
    x = jnp.dot(x.astype(jnp.bfloat16), sw_ref[d2:d2 + mlp, :],
                preferred_element_type=f32)
    x2_scr[...] = jnp.maximum(x + bias_ref[3:4, :mlp], 0.0)   # rows (agent, batch)

    # ---- fc3: per-agent weight blocks avoid the (ns,mlp)->(bs,A*mlp) relayout;
    #      fc3 weight columns padded 8->32, sliced back to n_bins at the end.
    off = d2 + mlp
    z32 = jnp.dot(extra_ref[...].astype(jnp.bfloat16),
                  sw_ref[off + n_agents * mlp: off + n_agents * mlp + n_extra, :],
                  preferred_element_type=f32) + bias_ref[4:5, :mlp]
    for a in range(n_agents):
        xa = x2_scr[a * bs:(a + 1) * bs, :].astype(jnp.bfloat16)     # (bs, mlp)
        z32 = z32 + jnp.dot(xa, sw_ref[off + a * mlp: off + (a + 1) * mlp, :],
                            preferred_element_type=f32)
    z = z32[:, :n_bins]                                        # (bs, n_bins)
    z_ref[...] = z

    # ---- softmax, fused + deduplicated (one row per batch element) ----------
    m = jnp.max(z, axis=-1, keepdims=True)
    e = jnp.exp(z - m)
    s = jnp.sum(e, axis=-1, keepdims=True)
    prob_ref[...] = e * pl.reciprocal(s, approx=True)


# ------------------------------- forward --------------------------------------

def opre_weight_forward(kparams, inputs, hidden_state, t):
    rgb = inputs["RGB"]                                   # (bs, T, A, H, W, C) u8
    bs, n_agents = rgb.shape[0], rgb.shape[2]
    rgb_t = rgb[:, t]

    # torch bug-for-bug: .contiguous().view(bs*A, C, H, W) reinterprets the
    # HWC-contiguous bytes as CHW; reproduce by flattening the raw bytes and
    # letting the expanded conv1 weight index them in (c, h, w) order.
    # Rows ordered agent-major (agent, batch) so fc3's per-agent weight blocks
    # see contiguous sample slices.  u8 values are exact in bf16.
    img = (rgb_t.reshape(bs, n_agents, D0)
           .transpose(1, 0, 2)
           .reshape(bs * n_agents, D0)
           .astype(jnp.bfloat16))

    non_rgb = [inputs[k][:, t].reshape(bs, -1).astype(jnp.float32)
               for k in NON_RGB_KEYS]
    hidden2 = hidden_state.reshape(bs, -1).astype(jnp.float32)       # (bs, A*rnn)
    extra = jnp.concatenate(non_rgb + [hidden2], axis=1)             # (bs, 66)

    kernel = functools.partial(
        _opre_fused_kernel,
        bs=bs, n_agents=n_agents, d1=D1, d2=FC1_IN, mlp=MLP_SIZE,
        n_bins=OPRE_N_BINS, n_extra=extra.shape[1])

    def _full(shape):
        zeros = (0,) * len(shape)
        return pl.BlockSpec(shape, lambda i, _z=zeros: _z)

    args = (img, kparams["w1x"], kparams["w2x"], kparams["sw"],
            kparams["bias"], extra)

    z2, p2 = pl.pallas_call(
        kernel,
        out_shape=(jax.ShapeDtypeStruct((bs, OPRE_N_BINS), jnp.float32),
                   jax.ShapeDtypeStruct((bs, OPRE_N_BINS), jnp.float32)),
        grid=(1,),
        in_specs=[_full(a.shape) for a in args],
        out_specs=(_full((bs, OPRE_N_BINS)), _full((bs, OPRE_N_BINS))),
        scratch_shapes=[
            pltpu.VMEM((bs * n_agents, MLP_SIZE), jnp.float32),   # fc2 output
        ],
        compiler_params=pltpu.CompilerParams(dimension_semantics=("arbitrary",)),
    )(*args)

    # is_q=True: logits are shared across agents; tile the deduplicated result.
    z_full = jnp.broadcast_to(z2[:, None, :], (bs, n_agents, OPRE_N_BINS))
    p_full = jnp.broadcast_to(p2[:, None, :], (bs, n_agents, OPRE_N_BINS))
    return z_full, p_full


# ------------------------- pure-JAX reference ---------------------------------

def reference_forward(params, inputs, hidden_state, t):
    """Non-Pallas f32 replica of the PyTorch forward (for correctness check)."""
    prec = jax.lax.Precision.HIGHEST
    rgb_t = inputs["RGB"][:, t]
    bs, n_agents = rgb_t.shape[0], rgb_t.shape[1]
    img = rgb_t.reshape(bs * n_agents, IMG_C, IMG_H, IMG_W).astype(jnp.float32) / 255.0
    x = jax.lax.conv_general_dilated(
        img, params["conv1_w"], (CNN1_S, CNN1_S), "VALID",
        dimension_numbers=("NCHW", "OIHW", "NCHW"), precision=prec)
    x = jax.nn.relu(x + params["conv1_b"][None, :, None, None])
    x = jax.lax.conv_general_dilated(
        x, params["conv2_w"], (CNN2_S, CNN2_S), "VALID",
        dimension_numbers=("NCHW", "OIHW", "NCHW"), precision=prec)
    x = jax.nn.relu(x + params["conv2_b"][None, :, None, None])
    x = x.reshape(bs * n_agents, -1)
    x = jax.nn.relu(jnp.dot(x, params["fc1_w"].T, precision=prec) + params["fc1_b"])
    x = jax.nn.relu(jnp.dot(x, params["fc2_w"].T, precision=prec) + params["fc2_b"])
    non_rgb = [inputs[k][:, t].reshape(bs, -1).astype(jnp.float32) for k in NON_RGB_KEYS]
    feat = jnp.concatenate([x.reshape(bs, -1)] + non_rgb
                           + [hidden_state.reshape(bs, -1)], axis=1)
    z = jnp.dot(feat, params["fc3_w"].T, precision=prec) + params["fc3_b"]
    z_rep = jnp.broadcast_to(z[:, None, :], (bs, n_agents, z.shape[-1]))
    return z_rep, jax.nn.softmax(z_rep, axis=-1)


# --------------------------------- main ----------------------------------------

if __name__ == "__main__":
    key = jax.random.PRNGKey(0)
    k_p, k_rgb, k_nr, k_h = jax.random.split(key, 4)

    params = init_params(k_p)
    kparams = prepare_params(params)

    rgb = jax.random.randint(
        k_rgb, (BS, T_STEPS, N_AGENTS, IMG_H, IMG_W, IMG_C), 0, 256, jnp.int32
    ).astype(jnp.uint8)
    ready = jax.random.bernoulli(k_nr, 0.5, (BS, T_STEPS, N_AGENTS)).astype(jnp.float32)
    hidden_state = jax.random.normal(k_h, (BS, N_AGENTS, RNN_SIZE), jnp.float32)
    inputs = {"RGB": rgb, "READY_TO_SHOOT": ready}

    fwd = jax.jit(opre_weight_forward, static_argnums=(3,))
    z, z_prob = fwd(kparams, inputs, hidden_state, 1)
    z = jax.block_until_ready(z)
    z_prob = jax.block_until_ready(z_prob)

    z_ref, p_ref = reference_forward(params, inputs, hidden_state, 1)

    assert z.shape == (BS, N_AGENTS, OPRE_N_BINS)
    assert z_prob.shape == (BS, N_AGENTS, OPRE_N_BINS)
    # probabilities normalise (approx reciprocal -> loose tolerance)
    assert np.allclose(np.asarray(z_prob).sum(-1), 1.0, atol=5e-3)
    # is_q=True: logits broadcast identically across agents
    assert np.array_equal(np.asarray(z)[:, 0], np.asarray(z)[:, 1])
    # matches the f32 reference within bf16-matmul tolerance
    assert np.allclose(np.asarray(z), np.asarray(z_ref), atol=3e-2, rtol=5e-2)
    assert np.allclose(np.asarray(z_prob), np.asarray(p_ref), atol=2e-2, rtol=5e-2)

    print("KERNEL_OK")
</pallas_src>

<mosaic_0001>
module attributes {stable_mosaic.version = 11 : i64} {
  func.func @_opre_fused_kernel(%arg0: i32, %arg1: memref<4x768xbf16, #tpu.memory_space<vmem>>, %arg2: memref<768x392xbf16, #tpu.memory_space<vmem>>, %arg3: memref<392x400xbf16, #tpu.memory_space<vmem>>, %arg4: memref<562x32xbf16, #tpu.memory_space<vmem>>, %arg5: memref<5x400xf32, #tpu.memory_space<vmem>>, %arg6: memref<2x66xf32, #tpu.memory_space<vmem>>, %arg7: memref<2x8xf32, #tpu.memory_space<vmem>>, %arg8: memref<2x8xf32, #tpu.memory_space<vmem>>, %arg9: memref<4x32xf32, #tpu.memory_space<vmem>>) attributes {dimension_semantics = [#tpu.dimension_semantics<arbitrary>], iteration_bounds = array<i64: 1>, scalar_prefetch = 0 : i64, scratch_operands = 1 : i64, tpu.core_type = #tpu.core_type<tc>, window_params = [{pipeline_mode = #tpu.pipeline_mode<synchronous>, transform_indices = @transform_0, window_bounds = array<i64: 4, 768>}, {pipeline_mode = #tpu.pipeline_mode<synchronous>, transform_indices = @transform_1, window_bounds = array<i64: 768, 392>}, {pipeline_mode = #tpu.pipeline_mode<synchronous>, transform_indices = @transform_2, window_bounds = array<i64: 392, 400>}, {pipeline_mode = #tpu.pipeline_mode<synchronous>, transform_indices = @transform_3, window_bounds = array<i64: 562, 32>}, {pipeline_mode = #tpu.pipeline_mode<synchronous>, transform_indices = @transform_4, window_bounds = array<i64: 5, 400>}, {pipeline_mode = #tpu.pipeline_mode<synchronous>, transform_indices = @transform_5, window_bounds = array<i64: 2, 66>}, {pipeline_mode = #tpu.pipeline_mode<synchronous>, transform_indices = @transform_6, window_bounds = array<i64: 2, 8>}, {pipeline_mode = #tpu.pipeline_mode<synchronous>, transform_indices = @transform_7, window_bounds = array<i64: 2, 8>}]} {
    %c0 = arith.constant 0 : index
    %c0_0 = arith.constant 0 : index
    %0 = vector.load %arg1[%c0, %c0_0] : memref<4x768xbf16, #tpu.memory_space<vmem>>, vector<4x768xbf16>
    %c0_1 = arith.constant 0 : index
    %c0_2 = arith.constant 0 : index
    %1 = vector.load %arg2[%c0_1, %c0_2] : memref<768x392xbf16, #tpu.memory_space<vmem>>, vector<768x392xbf16>
    %cst = arith.constant dense<0.000000e+00> : vector<4x392xf32>
    %2 = tpu.matmul %0, %1, %cst {dimension_numbers = #tpu.dot_dimension_numbers<[1], [0], [0], [1], [0, 0, 1, 1], [], []>} : vector<4x768xbf16>, vector<768x392xbf16>, vector<4x392xf32> -> vector<4x392xf32>
    %c0_3 = arith.constant 0 : index
    %c0_4 = arith.constant 0 : index
    %3 = vector.load %arg5[%c0_3, %c0_4] : memref<5x400xf32, #tpu.memory_space<vmem>>, vector<1x392xf32>
    %4 = vector.broadcast %3 : vector<1x392xf32> to vector<4x392xf32>
    %5 = arith.addf %2, %4 : vector<4x392xf32>
    %cst_5 = arith.constant 0.000000e+00 : f32
    %6 = vector.broadcast %cst_5 : f32 to vector<4x392xf32>
    %7 = arith.maximumf %5, %6 : vector<4x392xf32>
    %8 = arith.truncf %7 : vector<4x392xf32> to vector<4x392xbf16>
    %c0_6 = arith.constant 0 : index
    %c0_7 = arith.constant 0 : index
    %9 = vector.load %arg3[%c0_6, %c0_7] : memref<392x400xbf16, #tpu.memory_space<vmem>>, vector<392x400xbf16>
    %cst_8 = arith.constant dense<0.000000e+00> : vector<4x400xf32>
    %10 = tpu.matmul %8, %9, %cst_8 {dimension_numbers = #tpu.dot_dimension_numbers<[1], [0], [0], [1], [0, 0, 1, 1], [], []>} : vector<4x392xbf16>, vector<392x400xbf16>, vector<4x400xf32> -> vector<4x400xf32>
    %c1 = arith.constant 1 : index
    %c0_9 = arith.constant 0 : index
    %11 = vector.load %arg5[%c1, %c0_9] : memref<5x400xf32, #tpu.memory_space<vmem>>, vector<1x400xf32>
    %12 = vector.broadcast %11 : vector<1x400xf32> to vector<4x400xf32>
    %13 = arith.addf %10, %12 : vector<4x400xf32>
    %cst_10 = arith.constant 0.000000e+00 : f32
    %14 = vector.broadcast %cst_10 : f32 to vector<4x400xf32>
    %15 = arith.maximumf %13, %14 : vector<4x400xf32>
    %16 = arith.truncf %15 : vector<4x400xf32> to vector<4x400xbf16>
    %c0_11 = arith.constant 0 : index
    %c0_12 = arith.constant 0 : index
    %17 = vector.load %arg4[%c0_11, %c0_12] : memref<562x32xbf16, #tpu.memory_space<vmem>>, vector<400x32xbf16>
    %cst_13 = arith.constant dense<0.000000e+00> : vector<4x32xf32>
    %18 = tpu.matmul %16, %17, %cst_13 {dimension_numbers = #tpu.dot_dimension_numbers<[1], [0], [0], [1], [0, 0, 1, 1], [], []>} : vector<4x400xbf16>, vector<400x32xbf16>, vector<4x32xf32> -> vector<4x32xf32>
    %c2 = arith.constant 2 : index
    %c0_14 = arith.constant 0 : index
    %19 = vector.load %arg5[%c2, %c0_14] : memref<5x400xf32, #tpu.memory_space<vmem>>, vector<1x32xf32>
    %20 = vector.broadcast %19 : vector<1x32xf32> to vector<4x32xf32>
    %21 = arith.addf %18, %20 : vector<4x32xf32>
    %cst_15 = arith.constant 0.000000e+00 : f32
    %22 = vector.broadcast %cst_15 : f32 to vector<4x32xf32>
    %23 = arith.maximumf %21, %22 : vector<4x32xf32>
    %24 = arith.truncf %23 : vector<4x32xf32> to vector<4x32xbf16>
    %c400 = arith.constant 400 : index
    %c0_16 = arith.constant 0 : index
    %25 = vector.load %arg4[%c400, %c0_16] : memref<562x32xbf16, #tpu.memory_space<vmem>>, vector<32x32xbf16>
    %cst_17 = arith.constant dense<0.000000e+00> : vector<4x32xf32>
    %26 = tpu.matmul %24, %25, %cst_17 {dimension_numbers = #tpu.dot_dimension_numbers<[1], [0], [0], [1], [0, 0, 1, 1], [], []>} : vector<4x32xbf16>, vector<32x32xbf16>, vector<4x32xf32> -> vector<4x32xf32>
    %c3 = arith.constant 3 : index
    %c0_18 = arith.constant 0 : index
    %27 = vector.load %arg5[%c3, %c0_18] : memref<5x400xf32, #tpu.memory_space<vmem>>, vector<1x32xf32>
    %28 = vector.broadcast %27 : vector<1x32xf32> to vector<4x32xf32>
    %29 = arith.addf %26, %28 : vector<4x32xf32>
    %cst_19 = arith.constant 0.000000e+00 : f32
    %30 = vector.broadcast %cst_19 : f32 to vector<4x32xf32>
    %31 = arith.maximumf %29, %30 : vector<4x32xf32>
    %c0_20 = arith.constant 0 : index
    %c0_21 = arith.constant 0 : index
    %32 = vector.load %arg9[%c0_20, %c0_21] : memref<4x32xf32, #tpu.memory_space<vmem>>, vector<4x32xf32>
    tpu.vector_store %arg9[%c0_20, %c0_21], %31 {strides = array<i32>} : memref<4x32xf32, #tpu.memory_space<vmem>>, vector<4x32xf32>,
    %c0_22 = arith.constant 0 : index
    %c0_23 = arith.constant 0 : index
    %33 = vector.load %arg6[%c0_22, %c0_23] : memref<2x66xf32, #tpu.memory_space<vmem>>, vector<2x66xf32>
    %34 = arith.truncf %33 : vector<2x66xf32> to vector<2x66xbf16>
    %c496 = arith.constant 496 : index
    %c0_24 = arith.constant 0 : index
    %35 = vector.load %arg4[%c496, %c0_24] : memref<562x32xbf16, #tpu.memory_space<vmem>>, vector<66x32xbf16>
    %cst_25 = arith.constant dense<0.000000e+00> : vector<2x32xf32>
    %36 = tpu.matmul %34, %35, %cst_25 {dimension_numbers = #tpu.dot_dimension_numbers<[1], [0], [0], [1], [0, 0, 1, 1], [], []>} : vector<2x66xbf16>, vector<66x32xbf16>, vector<2x32xf32> -> vector<2x32xf32>
    %c4 = arith.constant 4 : index
    %c0_26 = arith.constant 0 : index
    %37 = vector.load %arg5[%c4, %c0_26] : memref<5x400xf32, #tpu.memory_space<vmem>>, vector<1x32xf32>
    %38 = vector.broadcast %37 : vector<1x32xf32> to vector<2x32xf32>
    %39 = arith.addf %36, %38 : vector<2x32xf32>
    %c0_27 = arith.constant 0 : index
    %c0_28 = arith.constant 0 : index
    %40 = vector.load %arg9[%c0_27, %c0_28] : memref<4x32xf32, #tpu.memory_space<vmem>>, vector<2x32xf32>
    %41 = arith.truncf %40 : vector<2x32xf32> to vector<2x32xbf16>
    %c432 = arith.constant 432 : index
    %c0_29 = arith.constant 0 : index
    %42 = vector.load %arg4[%c432, %c0_29] : memref<562x32xbf16, #tpu.memory_space<vmem>>, vector<32x32xbf16>
    %cst_30 = arith.constant dense<0.000000e+00> : vector<2x32xf32>
    %43 = tpu.matmul %41, %42, %cst_30 {dimension_numbers = #tpu.dot_dimension_numbers<[1], [0], [0], [1], [0, 0, 1, 1], [], []>} : vector<2x32xbf16>, vector<32x32xbf16>, vector<2x32xf32> -> vector<2x32xf32>
    %44 = arith.addf %39, %43 : vector<2x32xf32>
    %c2_31 = arith.constant 2 : index
    %c0_32 = arith.constant 0 : index
    %45 = vector.load %arg9[%c2_31, %c0_32] : memref<4x32xf32, #tpu.memory_space<vmem>>, vector<2x32xf32>
    %46 = arith.truncf %45 : vector<2x32xf32> to vector<2x32xbf16>
    %c464 = arith.constant 464 : index
    %c0_33 = arith.constant 0 : index
    %47 = vector.load %arg4[%c464, %c0_33] : memref<562x32xbf16, #tpu.memory_space<vmem>>, vector<32x32xbf16>
    %cst_34 = arith.constant dense<0.000000e+00> : vector<2x32xf32>
    %48 = tpu.matmul %46, %47, %cst_34 {dimension_numbers = #tpu.dot_dimension_numbers<[1], [0], [0], [1], [0, 0, 1, 1], [], []>} : vector<2x32xbf16>, vector<32x32xbf16>, vector<2x32xf32> -> vector<2x32xf32>
    %49 = arith.addf %44, %48 : vector<2x32xf32>
    %50 = vector.extract_strided_slice %49 {offsets = [0, 0], sizes = [2, 8], strides = [1, 1]} : vector<2x32xf32> to vector<2x8xf32>
    %c0_35 = arith.constant 0 : index
    %c0_36 = arith.constant 0 : index
    %51 = vector.load %arg7[%c0_35, %c0_36] : memref<2x8xf32, #tpu.memory_space<vmem>>, vector<2x8xf32>
    tpu.vector_store %arg7[%c0_35, %c0_36], %50 {strides = array<i32>} : memref<2x8xf32, #tpu.memory_space<vmem>>, vector<2x8xf32>,
    %cst_37 = arith.constant dense<0xFF800000> : vector<2xf32>
    %52 = vector.multi_reduction <maximumf>, %50, %cst_37 [1] : vector<2x8xf32> to vector<2xf32>
    %53 = vector.shape_cast %52 : vector<2xf32> to vector<2x1xf32>
    %54 = vector.broadcast %53 : vector<2x1xf32> to vector<2x8xf32>
    %55 = arith.subf %50, %54 : vector<2x8xf32>
    %56 = math.exp %55 : vector<2x8xf32>
    %cst_38 = arith.constant dense<0.000000e+00> : vector<2xf32>
    %57 = vector.multi_reduction <add>, %56, %cst_38 [1] : vector<2x8xf32> to vector<2xf32>
    %58 = vector.shape_cast %57 : vector<2xf32> to vector<2x1xf32>
    %59 = tpu.reciprocal %58 {approx = true} : vector<2x1xf32> -> vector<2x1xf32>
    %60 = vector.broadcast %59 : vector<2x1xf32> to vector<2x8xf32>
    %61 = arith.mulf %56, %60 : vector<2x8xf32>
    %c0_39 = arith.constant 0 : index
    %c0_40 = arith.constant 0 : index
    %62 = vector.load %arg8[%c0_39, %c0_40] : memref<2x8xf32, #tpu.memory_space<vmem>>, vector<2x8xf32>
    tpu.vector_store %arg8[%c0_39, %c0_40], %61 {strides = array<i32>} : memref<2x8xf32, #tpu.memory_space<vmem>>, vector<2x8xf32>,
    return
  }
  func.func @transform_0(%arg0: i32) -> (i32, i32) {
    %c0_i32 = arith.constant 0 : i32
    %c0_i32_0 = arith.constant 0 : i32
    %c0_i32_1 = arith.constant 0 : i32
    return %c0_i32, %c0_i32_0 : i32, i32
  }
  func.func @transform_1(%arg0: i32) -> (i32, i32) {
    %c0_i32 = arith.constant 0 : i32
    %c0_i32_0 = arith.constant 0 : i32
    %c0_i32_1 = arith.constant 0 : i32
    return %c0_i32, %c0_i32_0 : i32, i32
  }
  func.func @transform_2(%arg0: i32) -> (i32, i32) {
    %c0_i32 = arith.constant 0 : i32
    %c0_i32_0 = arith.constant 0 : i32
    %c0_i32_1 = arith.constant 0 : i32
    return %c0_i32, %c0_i32_0 : i32, i32
  }
  func.func @transform_3(%arg0: i32) -> (i32, i32) {
    %c0_i32 = arith.constant 0 : i32
    %c0_i32_0 = arith.constant 0 : i32
    %c0_i32_1 = arith.constant 0 : i32
    return %c0_i32, %c0_i32_0 : i32, i32
  }
  func.func @transform_4(%arg0: i32) -> (i32, i32) {
    %c0_i32 = arith.constant 0 : i32
    %c0_i32_0 = arith.constant 0 : i32
    %c0_i32_1 = arith.constant 0 : i32
    return %c0_i32, %c0_i32_0 : i32, i32
  }
  func.func @transform_5(%arg0: i32) -> (i32, i32) {
    %c0_i32 = arith.constant 0 : i32
    %c0_i32_0 = arith.constant 0 : i32
    %c0_i32_1 = arith.constant 0 : i32
    return %c0_i32, %c0_i32_0 : i32, i32
  }
  func.func @transform_6(%arg0: i32) -> (i32, i32) {
    %c0_i32 = arith.constant 0 : i32
    %c0_i32_0 = arith.constant 0 : i32
    %c0_i32_1 = arith.constant 0 : i32
    return %c0_i32, %c0_i32_0 : i32, i32
  }
  func.func @transform_7(%arg0: i32) -> (i32, i32) {
    %c0_i32 = arith.constant 0 : i32
    %c0_i32_0 = arith.constant 0 : i32
    %c0_i32_1 = arith.constant 0 : i32
    return %c0_i32, %c0_i32_0 : i32, i32
  }
}

</mosaic_0001>

<bundles_post_ra>
// kernel: opre_weight_forward.1
= control target key start
LH: loop header
LB: loop body
LE: loop exit
PB: predicated region body
PF: predicated region fallthrough
CT: control target
= control target key end

     0   :  { %v222_v36 = vlaneseq  ;;  %v3806_v37 = vmov 1983009808   ;;  %vm2100_vm0 = vcmask 64512   ;;  %vm2104_vm1 = vcmask 1043456   ;;  %s4928_s1 = inlined_call_operand.vmem [shape: bf16[768,392], index: 1, kind: input, shape index: {}]   ;;  %s4929_s0 = inlined_call_operand.vmem [shape: bf16[4,768], index: 0, kind: input, shape index: {}]   ;;  %s4930_s2 = inlined_call_operand.vmem [shape: bf16[392,400], index: 2, kind: input, shape index: {}]   ;;  %s4931_s3 = inlined_call_operand.vmem [shape: bf16[562,32], index: 3, kind: input, shape index: {}]   ;;  %s4932_s4 = inlined_call_operand.vmem [shape: f32[5,400], index: 4, kind: input, shape index: {}]   ;;  %s4933_s5 = inlined_call_operand.vmem [shape: f32[2,66], index: 5, kind: input, shape index: {}]   ;;  %s4934_s6 = inlined_call_operand.vmem [shape: f32[2,8], index: 6, kind: output, shape index: {0}]   ;;  %s4935_s7 = inlined_call_operand.vmem [shape: f32[2,8], index: 7, kind: output, shape index: {1}]  }
   0x1   :  { %v3329_v0 = vld [vmem:[%s4928_s1 + $0x4] ss:$16 sps:$4 sm:$0xff]   ;;  %v3331_v1 = vld [vmem:[%s4928_s1 + $0xc] ss:$16 sps:$4 sm:$0xff]   ;;  %v3333_v2 = vld [vmem:[%s4928_s1] ss:$16 sps:$4 sm:$0xff]   ;;  %v246_v38 = vunpack.c.l.s4 %v3806_v37 }
   0x2   :  { %1235 = vmatprep.subr.bf16.mxu0 %v3329_v0  ;;  %v3334_v3 = vld [vmem:[%s4928_s1 + $0x8] ss:$16 sps:$4 sm:$0xff]   ;;  %1358 = vmatprep.subr.bf16.mxu1 %v3331_v1  ;;  %v3335_v4 = vld [vmem:[%s4928_s1 + $0x24] ss:$16 sps:$4 sm:$0xff]   ;;  %v3337_v5 = vld [vmem:[%s4928_s1 + $0x2c] ss:$16 sps:$4 sm:$0xff]  }
   0x3   :  { %1236 = vmatpush1.bf16.msra.mxu0 %v3333_v2  ;;  %1359 = vmatpush1.bf16.msra.mxu1 %v3334_v3  ;;  %v3339_v6 = vld [vmem:[%s4928_s1 + $0x20] ss:$16 sps:$4 sm:$0xff]   ;;  %v3340_v7 = vld [vmem:[%s4928_s1 + $0x28] ss:$16 sps:$4 sm:$0xff]   ;;  %v3341_v8 = vld [vmem:[%s4928_s1 + $0x44] ss:$16 sps:$4 sm:$0xff]   ;;  %v247_v43 = vunpack.c.0.s8 %v246_v38 }
   0x4   :  { %1237 = vmatprep.subr.bf16.mxu0 %v3335_v4  ;;  %1360 = vmatprep.subr.bf16.mxu1 %v3337_v5  ;;  %v3343_v9 = vld [vmem:[%s4928_s1 + $0x4c] ss:$16 sps:$4 sm:$0xff]   ;;  %v3345_v10 = vld [vmem:[%s4928_s1 + $0x40] ss:$16 sps:$4 sm:$0xff]   ;;  %v3346_v11 = vld [vmem:[%s4928_s1 + $0x48] ss:$16 sps:$4 sm:$0xff]  }
   0x5   :  { %v3347_v12 = vld [vmem:[%s4928_s1 + $0x64] ss:$16 sps:$4 sm:$0xff]   ;;  %v3349_v13 = vld [vmem:[%s4928_s1 + $0x6c] ss:$16 sps:$4 sm:$0xff]   ;;  %v3351_v14 = vld [vmem:[%s4928_s1 + $0x60] ss:$16 sps:$4 sm:$0xff]  }
   0x6   :  { %v3352_v15 = vld [vmem:[%s4928_s1 + $0x68] ss:$16 sps:$4 sm:$0xff]   ;;  %v3353_v16 = vld [vmem:[%s4928_s1 + $0x84] ss:$16 sps:$4 sm:$0xff]   ;;  %v3355_v17 = vld [vmem:[%s4928_s1 + $0x8c] ss:$16 sps:$4 sm:$0xff]  }
   0x7   :  { %1238 = vmatpush1.bf16.msra.mxu0 %v3339_v6  ;;  %1361 = vmatpush1.bf16.msra.mxu1 %v3340_v7  ;;  %v3357_v18 = vld [vmem:[%s4928_s1 + $0x80] ss:$16 sps:$4 sm:$0xff]   ;;  %v3358_v19 = vld [vmem:[%s4928_s1 + $0x88] ss:$16 sps:$4 sm:$0xff]   ;;  %v3359_v20 = vld [vmem:[%s4928_s1 + $0xa4] ss:$16 sps:$4 sm:$0xff]  }
   0x8   :  { %1239 = vmatprep.subr.bf16.mxu0 %v3341_v8  ;;  %1362 = vmatprep.subr.bf16.mxu1 %v3343_v9  ;;  %v3361_v21 = vld [vmem:[%s4928_s1 + $0xac] ss:$16 sps:$4 sm:$0xff]   ;;  %v3363_v22 = vld [vmem:[%s4928_s1 + $0xa0] ss:$16 sps:$4 sm:$0xff]   ;;  %v3364_v23 = vld [vmem:[%s4928_s1 + $0xa8] ss:$16 sps:$4 sm:$0xff]  }
   0x9   :  { %v3365_v24 = vld [vmem:[%s4928_s1 + $0xc4] ss:$16 sps:$4 sm:$0xff]   ;;  %v3367_v25 = vld [vmem:[%s4928_s1 + $0xcc] ss:$16 sps:$4 sm:$0xff]   ;;  %v3369_v26 = vld [vmem:[%s4928_s1 + $0xc0] ss:$16 sps:$4 sm:$0xff]  }
   0xa   :  { %v3370_v27 = vld [vmem:[%s4928_s1 + $0xc8] ss:$16 sps:$4 sm:$0xff]   ;;  %v3371_v28 = vld [vmem:[%s4928_s1 + $0xe4] ss:$16 sps:$4 sm:$0xff]   ;;  %v3373_v29 = vld [vmem:[%s4928_s1 + $0xec] ss:$16 sps:$4 sm:$0xff]  }
   0xb   :  { %1240 = vmatpush1.bf16.msra.mxu0 %v3345_v10  ;;  %1363 = vmatpush1.bf16.msra.mxu1 %v3346_v11  ;;  %v3375_v30 = vld [vmem:[%s4928_s1 + $0xe0] ss:$16 sps:$4 sm:$0xff]   ;;  %v3376_v31 = vld [vmem:[%s4928_s1 + $0xe8] ss:$16 sps:$4 sm:$0xff]   ;;  %v3377_v32 = vld [vmem:[%s4928_s1 + $0x104] ss:$16 sps:$4 sm:$0xff]  }
   0xc   :  { %1241 = vmatprep.subr.bf16.mxu0 %v3347_v12  ;;  %1364 = vmatprep.subr.bf16.mxu1 %v3349_v13  ;;  %v3379_v33 = vld [vmem:[%s4928_s1 + $0x10c] ss:$16 sps:$4 sm:$0xff]   ;;  %v3381_v34 = vld [vmem:[%s4928_s1 + $0x100] ss:$16 sps:$4 sm:$0xff]   ;;  %v3382_v35 = vld [vmem:[%s4928_s1 + $0x108] ss:$16 sps:$4 sm:$0xff]  }
   0xd   :  { %v3383_v39 = vld [vmem:[%s4928_s1 + $0x124] ss:$16 sps:$4 sm:$0xff]   ;;  %v3385_v40 = vld [vmem:[%s4928_s1 + $0x12c] ss:$16 sps:$4 sm:$0xff]   ;;  %v3387_v41 = vld [vmem:[%s4928_s1 + $0x120] ss:$16 sps:$4 sm:$0xff]  }
   0xe   :  { %v3967_v42 = vshrl.u32 %v222_v36, 7  ;;  %v3388_v44 = vld [vmem:[%s4928_s1 + $0x128] ss:$16 sps:$4 sm:$0xff]   ;;  %v3389_v45 = vld [vmem:[%s4928_s1 + $0x144] ss:$16 sps:$4 sm:$0xff]   ;;  %vm2490_vm2 = vcmask 130048  }
   0xf   :  { %1242 = vmatpush1.bf16.msra.mxu0 %v3351_v14  ;;  %1365 = vmatpush1.bf16.msra.mxu1 %v3352_v15  ;;  %v3391_v46 = vld [vmem:[%s4928_s1 + $0x14c] ss:$16 sps:$4 sm:$0xff]   ;;  %v3393_v47 = vld [vmem:[%s4928_s1 + $0x140] ss:$16 sps:$4 sm:$0xff]   ;;  %v3394_v48 = vld [vmem:[%s4928_s1 + $0x148] ss:$16 sps:$4 sm:$0xff]  }
  0x10   :  { %1243 = vmatprep.subr.bf16.mxu0 %v3353_v16  ;;  %1366 = vmatprep.subr.bf16.mxu1 %v3355_v17  ;;  %v250_v49 = vsub.s32 %v247_v43, %v3967_v42  ;;  %v3395_v50 = vld [vmem:[%s4928_s1 + $0x164] ss:$16 sps:$4 sm:$0xff]   ;;  %v3397_v51 = vld [vmem:[%s4928_s1 + $0x16c] ss:$16 sps:$4 sm:$0xff]   ;;  %v3399_v53 = vld [vmem:[%s4928_s1 + $0x160] ss:$16 sps:$4 sm:$0xff]  }
  0x11   :  { %v26_v52 = vld [vmem:[%s4929_s0] sm:$0xff]  ;;  %v3400_v55 = vld [vmem:[%s4928_s1 + $0x168] ss:$16 sps:$4 sm:$0xff]   ;;  %v3403_v57 = vld [vmem:[%s4928_s1 + $0x18c] ss:$16 sps:$4 sm:$0xff]   ;;  %vm3809_vm3 = vmmov 0  }
  0x12   :  { %v251_v54 = vrot.slane %v26_v52, %v250_v49  ;;  %v3401_v56 = vld [vmem:[%s4928_s1 + $0x184] ss:$16 sps:$4 sm:$0xff]   ;;  %v3405_v59 = vld [vmem:[%s4928_s1 + $0x180] ss:$16 sps:$4 sm:$0xff]   ;;  %v3406_v60 = vld [vmem:[%s4928_s1 + $0x188] ss:$16 sps:$4 sm:$0xff]   ;;  %v244_v7 = vcombine.high %v26_v52, %v26_v52 }
  0x13   :  { %1244 = vmatpush1.bf16.msra.mxu0 %v3357_v18  ;;  %1367 = vmatpush1.bf16.msra.mxu1 %v3358_v19  ;;  %v3407_v61 = vld [vmem:[%s4928_s1 + $0x1a4] ss:$16 sps:$4 sm:$0xff]   ;;  %v3409_v62 = vld [vmem:[%s4928_s1 + $0x1ac] ss:$16 sps:$4 sm:$0xff]   ;;  %v3411_v63 = vld [vmem:[%s4928_s1 + $0x1a0] ss:$16 sps:$4 sm:$0xff]  }
  0x14   :  { %1245 = vmatprep.subr.bf16.mxu0 %v3359_v20  ;;  %1368 = vmatprep.subr.bf16.mxu1 %v3361_v21  ;;  %v259_v58 = vcombine.high %v251_v54, %v251_v54  ;;  %v3412_v0 = vld [vmem:[%s4928_s1 + $0x1a8] ss:$16 sps:$4 sm:$0xff]   ;;  %v3413_v1 = vld [vmem:[%s4928_s1 + $0x1c4] ss:$16 sps:$4 sm:$0xff]   ;;  %v3415_v2 = vld [vmem:[%s4928_s1 + $0x1cc] ss:$16 sps:$4 sm:$0xff]   ;;  %v4054_v12 = vrot.slane %v244_v7, %v250_v49 }
  0x15   :  { %v3417_v3 = vld [vmem:[%s4928_s1 + $0x1c0] ss:$16 sps:$4 sm:$0xff]   ;;  %v3418_v4 = vld [vmem:[%s4928_s1 + $0x1c8] ss:$16 sps:$4 sm:$0xff]   ;;  %v3419_v5 = vld [vmem:[%s4928_s1 + $0x1e4] ss:$16 sps:$4 sm:$0xff]  }
  0x16   :  { %1267 = vmatprep.mubr.bf16.mxu0 %v259_v58  ;;  %1390 = vmatprep.mubr.bf16.mxu1 %v259_v58  ;;  %v3421_v6 = vld [vmem:[%s4928_s1 + $0x1ec] ss:$16 sps:$4 sm:$0xff]   ;;  %v3423_v8 = vld [vmem:[%s4928_s1 + $0x1e0] ss:$16 sps:$4 sm:$0xff]   ;;  %v3424_v9 = vld [vmem:[%s4928_s1 + $0x1e8] ss:$16 sps:$4 sm:$0xff]   ;;  %v260_v17 = vcombine.high %v4054_v12, %v4054_v12 }
  0x17   :  { %1246 = vmatpush1.bf16.msra.mxu0 %v3363_v22  ;;  %1369 = vmatpush1.bf16.msra.mxu1 %v3364_v23  ;;  %v3428_v10 = vld [vmem:[%s4928_s1 + $0x204] ss:$16 sps:$4 sm:$0xff]   ;;  %v3431_v11 = vld [vmem:[%s4928_s1 + $0x20c] ss:$16 sps:$4 sm:$0xff]   ;;  %v3426_v13 = vld [vmem:[%s4928_s1 + $0x200] ss:$16 sps:$4 sm:$0xff]  }
  0x18   :  { %1247 = vmatprep.subr.bf16.mxu0 %v3365_v24  ;;  %1370 = vmatprep.subr.bf16.mxu1 %v3367_v25  ;;  %v3429_v14 = vld [vmem:[%s4928_s1 + $0x208] ss:$16 sps:$4 sm:$0xff]   ;;  %v3434_v15 = vld [vmem:[%s4928_s1 + $0x224] ss:$16 sps:$4 sm:$0xff]   ;;  %v3437_v16 = vld [vmem:[%s4928_s1 + $0x22c] ss:$16 sps:$4 sm:$0xff]  }
  0x19   :  { %v3432_v18 = vld [vmem:[%s4928_s1 + $0x220] ss:$16 sps:$4 sm:$0xff]   ;;  %v3435_v19 = vld [vmem:[%s4928_s1 + $0x228] ss:$16 sps:$4 sm:$0xff]   ;;  %v3440_v20 = vld [vmem:[%s4928_s1 + $0x244] ss:$16 sps:$4 sm:$0xff]  }
  0x1a   :  { %v3443_v21 = vld [vmem:[%s4928_s1 + $0x24c] ss:$16 sps:$4 sm:$0xff]   ;;  %v3438_v22 = vld [vmem:[%s4928_s1 + $0x240] ss:$16 sps:$4 sm:$0xff]   ;;  %v3441_v23 = vld [vmem:[%s4928_s1 + $0x248] ss:$16 sps:$4 sm:$0xff]  }
  0x1b   :  { %1248 = vmatpush1.bf16.msra.mxu0 %v3369_v26  ;;  %1371 = vmatpush1.bf16.msra.mxu1 %v3370_v27  ;;  %v3446_v24 = vld [vmem:[%s4928_s1 + $0x264] ss:$16 sps:$4 sm:$0xff]   ;;  %v3449_v25 = vld [vmem:[%s4928_s1 + $0x26c] ss:$16 sps:$4 sm:$0xff]   ;;  %v3444_v26 = vld [vmem:[%s4928_s1 + $0x260] ss:$16 sps:$4 sm:$0xff]  }
  0x1c   :  { %1249 = vmatprep.subr.bf16.mxu0 %v3371_v28  ;;  %1372 = vmatprep.subr.bf16.mxu1 %v3373_v29  ;;  %v3447_v27 = vld [vmem:[%s4928_s1 + $0x268] ss:$16 sps:$4 sm:$0xff]   ;;  %v3452_v28 = vld [vmem:[%s4928_s1 + $0x284] ss:$16 sps:$4 sm:$0xff]   ;;  %v3455_v29 = vld [vmem:[%s4928_s1 + $0x28c] ss:$16 sps:$4 sm:$0xff]  }
  0x1d   :  { %v3464_v36 = vld [vmem:[%s4928_s1 + $0x2c4] ss:$16 sps:$4 sm:$0xff]   ;;  %v3467_v37 = vld [vmem:[%s4928_s1 + $0x2cc] ss:$16 sps:$4 sm:$0xff]   ;;  %v3462_v38 = vld [vmem:[%s4928_s1 + $0x2c0] ss:$16 sps:$4 sm:$0xff]  }
  0x1e   :  { %v3468_v43 = vld [vmem:[%s4928_s1 + $0x2e0] ss:$16 sps:$4 sm:$0xff]   ;;  %v3482_v49 = vld [vmem:[%s4928_s1 + $0x324] ss:$16 sps:$4 sm:$0xff]   ;;  %v3483_v52 = vld [vmem:[%s4928_s1 + $0x328] ss:$16 sps:$4 sm:$0xff]  }
  0x1f   :  { %1250 = vmatpush1.bf16.msra.mxu0 %v3375_v30  ;;  %1373 = vmatpush1.bf16.msra.mxu1 %v3376_v31  ;;  %v3450_v30 = vld [vmem:[%s4928_s1 + $0x280] ss:$16 sps:$4 sm:$0xff]   ;;  %v3453_v31 = vld [vmem:[%s4928_s1 + $0x288] ss:$16 sps:$4 sm:$0xff]   ;;  %v3497_v58 = vld [vmem:[%s4928_s1 + $0x36c] ss:$16 sps:$4 sm:$0xff]  }
  0x20   :  { %1251 = vmatprep.subr.bf16.mxu0 %v3377_v32  ;;  %1374 = vmatprep.subr.bf16.mxu1 %v3379_v33  ;;  %v3458_v32 = vld [vmem:[%s4928_s1 + $0x2a4] ss:$16 sps:$4 sm:$0xff]   ;;  %v3461_v33 = vld [vmem:[%s4928_s1 + $0x2ac] ss:$16 sps:$4 sm:$0xff]   ;;  %v3510_v7 = vld [vmem:[%s4928_s1 + $0x3c0] ss:$16 sps:$4 sm:$0xff]  }
  0x21   :  { %vm2593_vm4 = vcmask 261120   ;;  %vm2683_vm5 = vcmask 1040384   ;;  %vm2679_vm6 = vcmask 539648   ;;  %vm2638_vm7 = vcmask 257024  }
  0x22   :  { %vm2851_vm8 = vcmask 58368  }
  0x23   :  { %1252 = vmatpush1.bf16.msra.mxu0 %v3381_v34  ;;  %1375 = vmatpush1.bf16.msra.mxu1 %v3382_v35  ;;  %v3456_v34 = vld [vmem:[%s4928_s1 + $0x2a0] ss:$16 sps:$4 sm:$0xff]   ;;  %v3459_v35 = vld [vmem:[%s4928_s1 + $0x2a8] ss:$16 sps:$4 sm:$0xff]  }
  0x24   :  { %1253 = vmatprep.subr.bf16.mxu0 %v3383_v39  ;;  %1376 = vmatprep.subr.bf16.mxu1 %v3385_v40  ;;  %v3465_v39 = vld [vmem:[%s4928_s1 + $0x2c8] ss:$16 sps:$4 sm:$0xff]   ;;  %v3470_v40 = vld [vmem:[%s4928_s1 + $0x2e4] ss:$16 sps:$4 sm:$0xff]  }
  0x27   :  { %1254 = vmatpush1.bf16.msra.mxu0 %v3387_v41  ;;  %1377 = vmatpush1.bf16.msra.mxu1 %v3388_v44  ;;  %v3473_v41 = vld [vmem:[%s4928_s1 + $0x2ec] ss:$16 sps:$4 sm:$0xff]   ;;  %v3471_v44 = vld [vmem:[%s4928_s1 + $0x2e8] ss:$16 sps:$4 sm:$0xff]  }
  0x28   :  { %1255 = vmatprep.subr.bf16.mxu0 %v3389_v45  ;;  %1378 = vmatprep.subr.bf16.mxu1 %v3391_v46  ;;  %v3476_v45 = vld [vmem:[%s4928_s1 + $0x304] ss:$16 sps:$4 sm:$0xff]   ;;  %v3479_v46 = vld [vmem:[%s4928_s1 + $0x30c] ss:$16 sps:$4 sm:$0xff]  }
  0x2b   :  { %1256 = vmatpush1.bf16.msra.mxu0 %v3393_v47  ;;  %1379 = vmatpush1.bf16.msra.mxu1 %v3394_v48  ;;  %v3474_v47 = vld [vmem:[%s4928_s1 + $0x300] ss:$16 sps:$4 sm:$0xff]   ;;  %v3477_v48 = vld [vmem:[%s4928_s1 + $0x308] ss:$16 sps:$4 sm:$0xff]  }
  0x2c   :  { %1257 = vmatprep.subr.bf16.mxu0 %v3395_v50  ;;  %1380 = vmatprep.subr.bf16.mxu1 %v3397_v51  ;;  %v3485_v50 = vld [vmem:[%s4928_s1 + $0x32c] ss:$16 sps:$4 sm:$0xff]   ;;  %v3480_v51 = vld [vmem:[%s4928_s1 + $0x320] ss:$16 sps:$4 sm:$0xff]  }
  0x2f   :  { %1258 = vmatpush1.bf16.msra.mxu0 %v3399_v53  ;;  %1381 = vmatpush1.bf16.msra.mxu1 %v3400_v55  ;;  %v3488_v53 = vld [vmem:[%s4928_s1 + $0x344] ss:$16 sps:$4 sm:$0xff]   ;;  %v3486_v55 = vld [vmem:[%s4928_s1 + $0x340] ss:$16 sps:$4 sm:$0xff]  }
  0x30   :  { %1259 = vmatprep.subr.bf16.mxu0 %v3401_v56  ;;  %1382 = vmatprep.subr.bf16.mxu1 %v3403_v57  ;;  %v3489_v56 = vld [vmem:[%s4928_s1 + $0x348] ss:$16 sps:$4 sm:$0xff]   ;;  %v3494_v57 = vld [vmem:[%s4928_s1 + $0x364] ss:$16 sps:$4 sm:$0xff]  }
  0x33   :  { %1260 = vmatpush1.bf16.msra.mxu0 %v3405_v59  ;;  %1383 = vmatpush1.bf16.msra.mxu1 %v3406_v60  ;;  %v3492_v59 = vld [vmem:[%s4928_s1 + $0x360] ss:$16 sps:$4 sm:$0xff]   ;;  %v3495_v60 = vld [vmem:[%s4928_s1 + $0x368] ss:$16 sps:$4 sm:$0xff]  }
  0x34   :  { %1261 = vmatprep.subr.bf16.mxu0 %v3407_v61  ;;  %1384 = vmatprep.subr.bf16.mxu1 %v3409_v62  ;;  %v3500_v61 = vld [vmem:[%s4928_s1 + $0x384] ss:$16 sps:$4 sm:$0xff]   ;;  %v3503_v62 = vld [vmem:[%s4928_s1 + $0x38c] ss:$16 sps:$4 sm:$0xff]  }
  0x37   :  { %1262 = vmatpush1.bf16.msra.mxu0 %v3411_v63  ;;  %1385 = vmatpush1.bf16.msra.mxu1 %v3412_v0  ;;  %v3498_v63 = vld [vmem:[%s4928_s1 + $0x380] ss:$16 sps:$4 sm:$0xff]   ;;  %v3501_v0 = vld [vmem:[%s4928_s1 + $0x388] ss:$16 sps:$4 sm:$0xff]  }
  0x38   :  { %1263 = vmatprep.subr.bf16.mxu0 %v3413_v1  ;;  %1386 = vmatprep.subr.bf16.mxu1 %v3415_v2  ;;  %v3506_v1 = vld [vmem:[%s4928_s1 + $0x3a4] ss:$16 sps:$4 sm:$0xff]   ;;  %v3509_v2 = vld [vmem:[%s4928_s1 + $0x3ac] ss:$16 sps:$4 sm:$0xff]  }
  0x3b   :  { %1264 = vmatpush1.bf16.msra.mxu0 %v3417_v3  ;;  %1387 = vmatpush1.bf16.msra.mxu1 %v3418_v4  ;;  %v3504_v3 = vld [vmem:[%s4928_s1 + $0x3a0] ss:$16 sps:$4 sm:$0xff]   ;;  %v3507_v4 = vld [vmem:[%s4928_s1 + $0x3a8] ss:$16 sps:$4 sm:$0xff]  }
  0x3c   :  { %1265 = vmatprep.subr.bf16.mxu0 %v3419_v5  ;;  %1388 = vmatprep.subr.bf16.mxu1 %v3421_v6  ;;  %v3512_v5 = vld [vmem:[%s4928_s1 + $0x3c4] ss:$16 sps:$4 sm:$0xff]   ;;  %v3515_v6 = vld [vmem:[%s4928_s1 + $0x3cc] ss:$16 sps:$4 sm:$0xff]  }
  0x3f   :  { %1266 = vmatpush1.bf16.msra.mxu0 %v3423_v8  ;;  %1389 = vmatpush1.bf16.msra.mxu1 %v3424_v9  ;;  %v3513_v8 = vld [vmem:[%s4928_s1 + $0x3c8] ss:$16 sps:$4 sm:$0xff]   ;;  %v3518_v9 = vld [vmem:[%s4928_s1 + $0x3e4] ss:$16 sps:$4 sm:$0xff]  }
  0x40   :  { %1276 = vmatprep.subr.bf16.mxu0 %v3428_v10  ;;  %1399 = vmatprep.subr.bf16.mxu1 %v3431_v11  ;;  %v3521_v10 = vld [vmem:[%s4928_s1 + $0x3ec] ss:$16 sps:$4 sm:$0xff]   ;;  %v3516_v11 = vld [vmem:[%s4928_s1 + $0x3e0] ss:$16 sps:$4 sm:$0xff]  }
  0x42   :  { %1268 = vmatmul.mubr.bf16.vlgmr.msra.gmra.mrb[0].mxu0 %v251_v54  ;;  %1391 = vmatmul.mubr.bf16.vlgmr.msra.gmra.mrb[0].mxu1 %v251_v54  ;;  %v3491_v54 = vld [vmem:[%s4928_s1 + $0x34c] ss:$16 sps:$4 sm:$0xff]  }
  0x43   :  { %1277 = vmatpush1.bf16.msra.mxu0 %v3426_v13  ;;  %1400 = vmatpush1.bf16.msra.mxu1 %v3429_v14  ;;  %v3519_v13 = vld [vmem:[%s4928_s1 + $0x3e8] ss:$16 sps:$4 sm:$0xff]   ;;  %v3524_v14 = vld [vmem:[%s4928_s1 + $0x404] ss:$16 sps:$4 sm:$0xff]  }
  0x44   :  { %1278 = vmatprep.subr.bf16.mxu0 %v3434_v15  ;;  %1401 = vmatprep.subr.bf16.mxu1 %v3437_v16  ;;  %v3527_v15 = vld [vmem:[%s4928_s1 + $0x40c] ss:$16 sps:$4 sm:$0xff]   ;;  %v3522_v16 = vld [vmem:[%s4928_s1 + $0x400] ss:$16 sps:$4 sm:$0xff]  }
  0x45   :  { %1308 = vmatprep.mubr.bf16.mxu0 %v260_v17  ;;  %1431 = vmatprep.mubr.bf16.mxu1 %v260_v17  ;;  %v3525_v17 = vld [vmem:[%s4928_s1 + $0x408] ss:$16 sps:$4 sm:$0xff]  }
  0x47   :  { %1279 = vmatpush1.bf16.msra.mxu0 %v3432_v18  ;;  %1402 = vmatpush1.bf16.msra.mxu1 %v3435_v19  ;;  %v3530_v18 = vld [vmem:[%s4928_s1 + $0x424] ss:$16 sps:$4 sm:$0xff]   ;;  %v4262_v19 = vld.sshfl [vmem:[%s4929_s0 + $0x8] sm:$0x33 pattern:$0x76325410] }
  0x48   :  { %1280 = vmatprep.subr.bf16.mxu0 %v3440_v20  ;;  %1403 = vmatprep.subr.bf16.mxu1 %v3443_v21  ;;  %v3533_v20 = vld [vmem:[%s4928_s1 + $0x42c] ss:$16 sps:$4 sm:$0xff]   ;;  %v268_v21 = vcombine.high %v4262_v19, %v4262_v19 }
  0x4b   :  { %1281 = vmatpush1.bf16.msra.mxu0 %v3438_v22  ;;  %1404 = vmatpush1.bf16.msra.mxu1 %v3441_v23  ;;  %v3528_v22 = vld [vmem:[%s4928_s1 + $0x420] ss:$16 sps:$4 sm:$0xff]   ;;  %v3531_v23 = vld [vmem:[%s4928_s1 + $0x428] ss:$16 sps:$4 sm:$0xff]  }
  0x4c   :  { %1282 = vmatprep.subr.bf16.mxu0 %v3446_v24  ;;  %1405 = vmatprep.subr.bf16.mxu1 %v3449_v25  ;;  %v3536_v24 = vld [vmem:[%s4928_s1 + $0x444] ss:$16 sps:$4 sm:$0xff]   ;;  %v3534_v25 = vld [vmem:[%s4928_s1 + $0x440] ss:$16 sps:$4 sm:$0xff]  }
  0x4f   :  { %1283 = vmatpush1.bf16.msra.mxu0 %v3444_v26  ;;  %1406 = vmatpush1.bf16.msra.mxu1 %v3447_v27  ;;  %v3537_v26 = vld [vmem:[%s4928_s1 + $0x448] ss:$16 sps:$4 sm:$0xff]   ;;  %v3542_v27 = vld [vmem:[%s4928_s1 + $0x464] ss:$16 sps:$4 sm:$0xff]  }
  0x50   :  { %1284 = vmatprep.subr.bf16.mxu0 %v3452_v28  ;;  %1407 = vmatprep.subr.bf16.mxu1 %v3455_v29  ;;  %v3545_v28 = vld [vmem:[%s4928_s1 + $0x46c] ss:$16 sps:$4 sm:$0xff]   ;;  %v3540_v29 = vld [vmem:[%s4928_s1 + $0x460] ss:$16 sps:$4 sm:$0xff]  }
  0x53   :  { %1285 = vmatpush1.bf16.msra.mxu0 %v3450_v30  ;;  %1408 = vmatpush1.bf16.msra.mxu1 %v3453_v31  ;;  %v3543_v30 = vld [vmem:[%s4928_s1 + $0x468] ss:$16 sps:$4 sm:$0xff]   ;;  %v3548_v31 = vld [vmem:[%s4928_s1 + $0x484] ss:$16 sps:$4 sm:$0xff]  }
  0x54   :  { %1286 = vmatprep.subr.bf16.mxu0 %v3458_v32  ;;  %1409 = vmatprep.subr.bf16.mxu1 %v3461_v33  ;;  %v3551_v32 = vld [vmem:[%s4928_s1 + $0x48c] ss:$16 sps:$4 sm:$0xff]   ;;  %v3546_v33 = vld [vmem:[%s4928_s1 + $0x480] ss:$16 sps:$4 sm:$0xff]  }
  0x57   :  { %1287 = vmatpush1.bf16.msra.mxu0 %v3456_v34  ;;  %1410 = vmatpush1.bf16.msra.mxu1 %v3459_v35  ;;  %v3549_v34 = vld [vmem:[%s4928_s1 + $0x488] ss:$16 sps:$4 sm:$0xff]   ;;  %v3554_v35 = vld [vmem:[%s4928_s1 + $0x4a4] ss:$16 sps:$4 sm:$0xff]  }
  0x58   :  { %1288 = vmatprep.subr.bf16.mxu0 %v3464_v36  ;;  %1411 = vmatprep.subr.bf16.mxu1 %v3467_v37  ;;  %v3557_v36 = vld [vmem:[%s4928_s1 + $0x4ac] ss:$16 sps:$4 sm:$0xff]   ;;  %v3552_v37 = vld [vmem:[%s4928_s1 + $0x4a0] ss:$16 sps:$4 sm:$0xff]  }
  0x5b   :  { %1289 = vmatpush1.bf16.msra.mxu0 %v3462_v38  ;;  %1412 = vmatpush1.bf16.msra.mxu1 %v3465_v39  ;;  %v3555_v38 = vld [vmem:[%s4928_s1 + $0x4a8] ss:$16 sps:$4 sm:$0xff]   ;;  %v3560_v39 = vld [vmem:[%s4928_s1 + $0x4c4] ss:$16 sps:$4 sm:$0xff]  }
  0x5c   :  { %1290 = vmatprep.subr.bf16.mxu0 %v3470_v40  ;;  %1413 = vmatprep.subr.bf16.mxu1 %v3473_v41  ;;  %v3563_v40 = vld [vmem:[%s4928_s1 + $0x4cc] ss:$16 sps:$4 sm:$0xff]   ;;  %v3558_v41 = vld [vmem:[%s4928_s1 + $0x4c0] ss:$16 sps:$4 sm:$0xff]  }
  0x5f   :  { %1291 = vmatpush1.bf16.msra.mxu0 %v3468_v43  ;;  %1414 = vmatpush1.bf16.msra.mxu1 %v3471_v44  ;;  %v3561_v43 = vld [vmem:[%s4928_s1 + $0x4c8] ss:$16 sps:$4 sm:$0xff]   ;;  %v3566_v44 = vld [vmem:[%s4928_s1 + $0x4e4] ss:$16 sps:$4 sm:$0xff]  }
  0x60   :  { %1292 = vmatprep.subr.bf16.mxu0 %v3476_v45  ;;  %1415 = vmatprep.subr.bf16.mxu1 %v3479_v46  ;;  %v3569_v45 = vld [vmem:[%s4928_s1 + $0x4ec] ss:$16 sps:$4 sm:$0xff]   ;;  %v3564_v46 = vld [vmem:[%s4928_s1 + $0x4e0] ss:$16 sps:$4 sm:$0xff]  }
  0x63   :  { %1293 = vmatpush1.bf16.msra.mxu0 %v3474_v47  ;;  %1416 = vmatpush1.bf16.msra.mxu1 %v3477_v48  ;;  %v3567_v47 = vld [vmem:[%s4928_s1 + $0x4e8] ss:$16 sps:$4 sm:$0xff]   ;;  %v3572_v48 = vld [vmem:[%s4928_s1 + $0x504] ss:$16 sps:$4 sm:$0xff]  }
  0x64   :  { %1294 = vmatprep.subr.bf16.mxu0 %v3482_v49  ;;  %1417 = vmatprep.subr.bf16.mxu1 %v3485_v50  ;;  %v3575_v49 = vld [vmem:[%s4928_s1 + $0x50c] ss:$16 sps:$4 sm:$0xff]   ;;  %v3570_v50 = vld [vmem:[%s4928_s1 + $0x500] ss:$16 sps:$4 sm:$0xff]  }
  0x67   :  { %1295 = vmatpush1.bf16.msra.mxu0 %v3480_v51  ;;  %1418 = vmatpush1.bf16.msra.mxu1 %v3483_v52  ;;  %v3573_v51 = vld [vmem:[%s4928_s1 + $0x508] ss:$16 sps:$4 sm:$0xff]   ;;  %v3578_v52 = vld [vmem:[%s4928_s1 + $0x524] ss:$16 sps:$4 sm:$0xff]  }
  0x68   :  { %1296 = vmatprep.subr.bf16.mxu0 %v3488_v53  ;;  %1419 = vmatprep.subr.bf16.mxu1 %v3491_v54  ;;  %v3581_v53 = vld [vmem:[%s4928_s1 + $0x52c] ss:$16 sps:$4 sm:$0xff]   ;;  %v3576_v54 = vld [vmem:[%s4928_s1 + $0x520] ss:$16 sps:$4 sm:$0xff]  }
  0x6b   :  { %1297 = vmatpush1.bf16.msra.mxu0 %v3486_v55  ;;  %1420 = vmatpush1.bf16.msra.mxu1 %v3489_v56  ;;  %v3579_v55 = vld [vmem:[%s4928_s1 + $0x528] ss:$16 sps:$4 sm:$0xff]   ;;  %v3584_v56 = vld [vmem:[%s4928_s1 + $0x544] ss:$16 sps:$4 sm:$0xff]  }
  0x6c   :  { %1298 = vmatprep.subr.bf16.mxu0 %v3494_v57  ;;  %1421 = vmatprep.subr.bf16.mxu1 %v3497_v58  ;;  %v3587_v57 = vld [vmem:[%s4928_s1 + $0x54c] ss:$16 sps:$4 sm:$0xff]   ;;  %v3582_v58 = vld [vmem:[%s4928_s1 + $0x540] ss:$16 sps:$4 sm:$0xff]  }
  0x6f   :  { %1299 = vmatpush1.bf16.msra.mxu0 %v3492_v59  ;;  %1422 = vmatpush1.bf16.msra.mxu1 %v3495_v60  ;;  %v3585_v59 = vld [vmem:[%s4928_s1 + $0x548] ss:$16 sps:$4 sm:$0xff]   ;;  %v3590_v60 = vld [vmem:[%s4928_s1 + $0x564] ss:$16 sps:$4 sm:$0xff]  }
  0x70   :  { %1300 = vmatprep.subr.bf16.mxu0 %v3500_v61  ;;  %1423 = vmatprep.subr.bf16.mxu1 %v3503_v62  ;;  %v3593_v61 = vld [vmem:[%s4928_s1 + $0x56c] ss:$16 sps:$4 sm:$0xff]   ;;  %v3588_v62 = vld [vmem:[%s4928_s1 + $0x560] ss:$16 sps:$4 sm:$0xff]  }
  0x73   :  { %1301 = vmatpush1.bf16.msra.mxu0 %v3498_v63  ;;  %1424 = vmatpush1.bf16.msra.mxu1 %v3501_v0  ;;  %v3591_v63 = vld [vmem:[%s4928_s1 + $0x568] ss:$16 sps:$4 sm:$0xff]   ;;  %v3596_v0 = vld [vmem:[%s4928_s1 + $0x584] ss:$16 sps:$4 sm:$0xff]  }
  0x74   :  { %1302 = vmatprep.subr.bf16.mxu0 %v3506_v1  ;;  %1425 = vmatprep.subr.bf16.mxu1 %v3509_v2  ;;  %v3599_v1 = vld [vmem:[%s4928_s1 + $0x58c] ss:$16 sps:$4 sm:$0xff]   ;;  %v3594_v2 = vld [vmem:[%s4928_s1 + $0x580] ss:$16 sps:$4 sm:$0xff]  }
  0x77   :  { %1303 = vmatpush1.bf16.msra.mxu0 %v3504_v3  ;;  %1426 = vmatpush1.bf16.msra.mxu1 %v3507_v4  ;;  %v3597_v3 = vld [vmem:[%s4928_s1 + $0x588] ss:$16 sps:$4 sm:$0xff]   ;;  %v3602_v4 = vld [vmem:[%s4928_s1 + $0x5a4] ss:$16 sps:$4 sm:$0xff]  }
  0x78   :  { %1304 = vmatprep.subr.bf16.mxu0 %v3512_v5  ;;  %1427 = vmatprep.subr.bf16.mxu1 %v3515_v6  ;;  %v3605_v5 = vld [vmem:[%s4928_s1 + $0x5ac] ss:$16 sps:$4 sm:$0xff]   ;;  %v3600_v6 = vld [vmem:[%s4928_s1 + $0x5a0] ss:$16 sps:$4 sm:$0xff]  }
  0x7b   :  { %1305 = vmatpush1.bf16.msra.mxu0 %v3510_v7  ;;  %1428 = vmatpush1.bf16.msra.mxu1 %v3513_v8  ;;  %v3603_v7 = vld [vmem:[%s4928_s1 + $0x5a8] ss:$16 sps:$4 sm:$0xff]   ;;  %v3608_v8 = vld [vmem:[%s4928_s1 + $0x5c4] ss:$16 sps:$4 sm:$0xff]  }
  0x7c   :  { %1306 = vmatprep.subr.bf16.mxu0 %v3518_v9  ;;  %1429 = vmatprep.subr.bf16.mxu1 %v3521_v10  ;;  %v3611_v9 = vld [vmem:[%s4928_s1 + $0x5cc] ss:$16 sps:$4 sm:$0xff]   ;;  %v3606_v10 = vld [vmem:[%s4928_s1 + $0x5c0] ss:$16 sps:$4 sm:$0xff]  }
  0x7f   :  { %1307 = vmatpush1.bf16.msra.mxu0 %v3516_v11  ;;  %1430 = vmatpush1.bf16.msra.mxu1 %v3519_v13  ;;  %v3609_v11 = vld [vmem:[%s4928_s1 + $0x5c8] ss:$16 sps:$4 sm:$0xff]   ;;  %v3614_v13 = vld [vmem:[%s4928_s1 + $0x5e4] ss:$16 sps:$4 sm:$0xff]  }
  0x80   :  { %1317 = vmatprep.subr.bf16.mxu0 %v3524_v14  ;;  %1440 = vmatprep.subr.bf16.mxu1 %v3527_v15  ;;  %v3617_v14 = vld [vmem:[%s4928_s1 + $0x5ec] ss:$16 sps:$4 sm:$0xff]   ;;  %v3612_v15 = vld [vmem:[%s4928_s1 + $0x5e0] ss:$16 sps:$4 sm:$0xff]  }
  0x82   :  { %1309 = vmatmul.mubr.bf16.vlgmr.msra.gmra.mrb[0].mxu0 %v4054_v12  ;;  %1432 = vmatmul.mubr.bf16.vlgmr.msra.gmra.mrb[0].mxu1 %v4054_v12  ;;  %v3539_v12 = vld [vmem:[%s4928_s1 + $0x44c] ss:$16 sps:$4 sm:$0xff]  }
  0x83   :  { %1318 = vmatpush1.bf16.msra.mxu0 %v3522_v16  ;;  %1441 = vmatpush1.bf16.msra.mxu1 %v3525_v17  ;;  %v3615_v16 = vld [vmem:[%s4928_s1 + $0x5e8] ss:$16 sps:$4 sm:$0xff]   ;;  %v3620_v17 = vld [vmem:[%s4930_s2 + $0x4] ss:$16 sps:$4 sm:$0xff]  }
  0x84   :  { %1319 = vmatprep.subr.bf16.mxu0 %v3530_v18  ;;  %1442 = vmatprep.subr.bf16.mxu1 %v3533_v20  ;;  %v3623_v18 = vld [vmem:[%s4930_s2 + $0xc] ss:$16 sps:$4 sm:$0xff]   ;;  %v3618_v20 = vld [vmem:[%s4930_s2] ss:$16 sps:$4 sm:$0xff]  }
  0x85   :  { %1349 = vmatprep.mubr.bf16.mxu0 %v268_v21  ;;  %1472 = vmatprep.mubr.bf16.mxu1 %v268_v21  ;;  %v3621_v21 = vld [vmem:[%s4930_s2 + $0x8] ss:$16 sps:$4 sm:$0xff]  }
  0x87   :  { %1320 = vmatpush1.bf16.msra.mxu0 %v3528_v22  ;;  %1443 = vmatpush1.bf16.msra.mxu1 %v3531_v23  ;;  %v3626_v22 = vld [vmem:[%s4930_s2 + $0x24] ss:$16 sps:$4 sm:$0xff]   ;;  %v3629_v23 = vld [vmem:[%s4930_s2 + $0x2c] ss:$16 sps:$4 sm:$0xff]  }
  0x88   :  { %1321 = vmatprep.subr.bf16.mxu0 %v3536_v24  ;;  %1444 = vmatprep.subr.bf16.mxu1 %v3539_v12  ;;  %v3624_v24 = vld [vmem:[%s4930_s2 + $0x20] ss:$16 sps:$4 sm:$0xff]   ;;  %v3627_v12 = vld [vmem:[%s4930_s2 + $0x28] ss:$16 sps:$4 sm:$0xff]  }
  0x8b   :  { %1322 = vmatpush1.bf16.msra.mxu0 %v3534_v25  ;;  %1445 = vmatpush1.bf16.msra.mxu1 %v3537_v26  ;;  %v3632_v25 = vld [vmem:[%s4930_s2 + $0x44] ss:$16 sps:$4 sm:$0xff]   ;;  %v3630_v26 = vld [vmem:[%s4930_s2 + $0x40] ss:$16 sps:$4 sm:$0xff]  }
  0x8c   :  { %1323 = vmatprep.subr.bf16.mxu0 %v3542_v27  ;;  %1446 = vmatprep.subr.bf16.mxu1 %v3545_v28  ;;  %v3633_v27 = vld [vmem:[%s4930_s2 + $0x48] ss:$16 sps:$4 sm:$0xff]   ;;  %v3638_v28 = vld [vmem:[%s4930_s2 + $0x64] ss:$16 sps:$4 sm:$0xff]  }
  0x8f   :  { %1324 = vmatpush1.bf16.msra.mxu0 %v3540_v29  ;;  %1447 = vmatpush1.bf16.msra.mxu1 %v3543_v30  ;;  %v3641_v29 = vld [vmem:[%s4930_s2 + $0x6c] ss:$16 sps:$4 sm:$0xff]   ;;  %v3636_v30 = vld [vmem:[%s4930_s2 + $0x60] ss:$16 sps:$4 sm:$0xff]  }
  0x90   :  { %1325 = vmatprep.subr.bf16.mxu0 %v3548_v31  ;;  %1448 = vmatprep.subr.bf16.mxu1 %v3551_v32  ;;  %v3639_v31 = vld [vmem:[%s4930_s2 + $0x68] ss:$16 sps:$4 sm:$0xff]   ;;  %v3644_v32 = vld [vmem:[%s4930_s2 + $0x84] ss:$16 sps:$4 sm:$0xff]  }
  0x93   :  { %1326 = vmatpush1.bf16.msra.mxu0 %v3546_v33  ;;  %1449 = vmatpush1.bf16.msra.mxu1 %v3549_v34  ;;  %v3647_v33 = vld [vmem:[%s4930_s2 + $0x8c] ss:$16 sps:$4 sm:$0xff]   ;;  %v3642_v34 = vld [vmem:[%s4930_s2 + $0x80] ss:$16 sps:$4 sm:$0xff]  }
  0x94   :  { %1327 = vmatprep.subr.bf16.mxu0 %v3554_v35  ;;  %1450 = vmatprep.subr.bf16.mxu1 %v3557_v36  ;;  %v3645_v35 = vld [vmem:[%s4930_s2 + $0x88] ss:$16 sps:$4 sm:$0xff]   ;;  %v3650_v36 = vld [vmem:[%s4930_s2 + $0xa4] ss:$16 sps:$4 sm:$0xff]  }
  0x97   :  { %1328 = vmatpush1.bf16.msra.mxu0 %v3552_v37  ;;  %1451 = vmatpush1.bf16.msra.mxu1 %v3555_v38  ;;  %v3653_v37 = vld [vmem:[%s4930_s2 + $0xac] ss:$16 sps:$4 sm:$0xff]   ;;  %v3648_v38 = vld [vmem:[%s4930_s2 + $0xa0] ss:$16 sps:$4 sm:$0xff]  }
  0x98   :  { %1329 = vmatprep.subr.bf16.mxu0 %v3560_v39  ;;  %1452 = vmatprep.subr.bf16.mxu1 %v3563_v40  ;;  %v3651_v39 = vld [vmem:[%s4930_s2 + $0xa8] ss:$16 sps:$4 sm:$0xff]   ;;  %v3656_v40 = vld [vmem:[%s4930_s2 + $0xc4] ss:$16 sps:$4 sm:$0xff]  }
  0x9b   :  { %1330 = vmatpush1.bf16.msra.mxu0 %v3558_v41  ;;  %1453 = vmatpush1.bf16.msra.mxu1 %v3561_v43  ;;  %v3659_v41 = vld [vmem:[%s4930_s2 + $0xcc] ss:$16 sps:$4 sm:$0xff]   ;;  %v3654_v43 = vld [vmem:[%s4930_s2 + $0xc0] ss:$16 sps:$4 sm:$0xff]  }
  0x9c   :  { %1331 = vmatprep.subr.bf16.mxu0 %v3566_v44  ;;  %1454 = vmatprep.subr.bf16.mxu1 %v3569_v45  ;;  %v3657_v44 = vld [vmem:[%s4930_s2 + $0xc8] ss:$16 sps:$4 sm:$0xff]   ;;  %v3662_v45 = vld [vmem:[%s4930_s2 + $0xe4] ss:$16 sps:$4 sm:$0xff]  }
  0x9f   :  { %1332 = vmatpush1.bf16.msra.mxu0 %v3564_v46  ;;  %1455 = vmatpush1.bf16.msra.mxu1 %v3567_v47  ;;  %v3665_v46 = vld [vmem:[%s4930_s2 + $0xec] ss:$16 sps:$4 sm:$0xff]   ;;  %v3660_v47 = vld [vmem:[%s4930_s2 + $0xe0] ss:$16 sps:$4 sm:$0xff]  }
  0xa0   :  { %1333 = vmatprep.subr.bf16.mxu0 %v3572_v48  ;;  %1456 = vmatprep.subr.bf16.mxu1 %v3575_v49  ;;  %v3663_v48 = vld [vmem:[%s4930_s2 + $0xe8] ss:$16 sps:$4 sm:$0xff]   ;;  %v3668_v49 = vld [vmem:[%s4930_s2 + $0x104] ss:$16 sps:$4 sm:$0xff]  }
  0xa3   :  { %1334 = vmatpush1.bf16.msra.mxu0 %v3570_v50  ;;  %1457 = vmatpush1.bf16.msra.mxu1 %v3573_v51  ;;  %v3671_v50 = vld [vmem:[%s4930_s2 + $0x10c] ss:$16 sps:$4 sm:$0xff]   ;;  %v3666_v51 = vld [vmem:[%s4930_s2 + $0x100] ss:$16 sps:$4 sm:$0xff]  }
  0xa4   :  { %1335 = vmatprep.subr.bf16.mxu0 %v3578_v52  ;;  %1458 = vmatprep.subr.bf16.mxu1 %v3581_v53  ;;  %v3669_v52 = vld [vmem:[%s4930_s2 + $0x108] ss:$16 sps:$4 sm:$0xff]   ;;  %v3674_v53 = vld [vmem:[%s4930_s2 + $0x124] ss:$16 sps:$4 sm:$0xff]  }
  0xa7   :  { %1336 = vmatpush1.bf16.msra.mxu0 %v3576_v54  ;;  %1459 = vmatpush1.bf16.msra.mxu1 %v3579_v55  ;;  %v3677_v54 = vld [vmem:[%s4930_s2 + $0x12c] ss:$16 sps:$4 sm:$0xff]   ;;  %v3672_v55 = vld [vmem:[%s4930_s2 + $0x120] ss:$16 sps:$4 sm:$0xff]  }
  0xa8   :  { %1337 = vmatprep.subr.bf16.mxu0 %v3584_v56  ;;  %1460 = vmatprep.subr.bf16.mxu1 %v3587_v57  ;;  %v3675_v56 = vld [vmem:[%s4930_s2 + $0x128] ss:$16 sps:$4 sm:$0xff]   ;;  %v3680_v57 = vld [vmem:[%s4930_s2 + $0x144] ss:$16 sps:$4 sm:$0xff]  }
  0xab   :  { %1338 = vmatpush1.bf16.msra.mxu0 %v3582_v58  ;;  %1461 = vmatpush1.bf16.msra.mxu1 %v3585_v59  ;;  %v3683_v58 = vld [vmem:[%s4930_s2 + $0x14c] ss:$16 sps:$4 sm:$0xff]   ;;  %v3678_v59 = vld [vmem:[%s4930_s2 + $0x140] ss:$16 sps:$4 sm:$0xff]  }
  0xac   :  { %1339 = vmatprep.subr.bf16.mxu0 %v3590_v60  ;;  %1462 = vmatprep.subr.bf16.mxu1 %v3593_v61  ;;  %v3681_v60 = vld [vmem:[%s4930_s2 + $0x148] ss:$16 sps:$4 sm:$0xff]   ;;  %v3686_v61 = vld [vmem:[%s4930_s2 + $0x164] ss:$16 sps:$4 sm:$0xff]  }
  0xaf   :  { %1340 = vmatpush1.bf16.msra.mxu0 %v3588_v62  ;;  %1463 = vmatpush1.bf16.msra.mxu1 %v3591_v63  ;;  %v3689_v62 = vld [vmem:[%s4930_s2 + $0x16c] ss:$16 sps:$4 sm:$0xff]   ;;  %v3684_v63 = vld [vmem:[%s4930_s2 + $0x160] ss:$16 sps:$4 sm:$0xff]  }
  0xb0   :  { %1341 = vmatprep.subr.bf16.mxu0 %v3596_v0  ;;  %1464 = vmatprep.subr.bf16.mxu1 %v3599_v1  ;;  %v3687_v0 = vld [vmem:[%s4930_s2 + $0x168] ss:$16 sps:$4 sm:$0xff]   ;;  %v3692_v1 = vld [vmem:[%s4930_s2 + $0x184] ss:$16 sps:$4 sm:$0xff]  }
  0xb3   :  { %1342 = vmatpush1.bf16.msra.mxu0 %v3594_v2  ;;  %1465 = vmatpush1.bf16.msra.mxu1 %v3597_v3  ;;  %v3695_v2 = vld [vmem:[%s4930_s2 + $0x18c] ss:$16 sps:$4 sm:$0xff]   ;;  %v3690_v3 = vld [vmem:[%s4930_s2 + $0x180] ss:$16 sps:$4 sm:$0xff]  }
  0xb4   :  { %1343 = vmatprep.subr.bf16.mxu0 %v3602_v4  ;;  %1466 = vmatprep.subr.bf16.mxu1 %v3605_v5  ;;  %v3693_v4 = vld [vmem:[%s4930_s2 + $0x188] ss:$16 sps:$4 sm:$0xff]   ;;  %v3698_v5 = vld [vmem:[%s4930_s2 + $0x1a4] ss:$16 sps:$4 sm:$0xff]  }
  0xb7   :  { %1344 = vmatpush1.bf16.msra.mxu0 %v3600_v6  ;;  %1467 = vmatpush1.bf16.msra.mxu1 %v3603_v7  ;;  %v3701_v6 = vld [vmem:[%s4930_s2 + $0x1ac] ss:$16 sps:$4 sm:$0xff]   ;;  %v3696_v7 = vld [vmem:[%s4930_s2 + $0x1a0] ss:$16 sps:$4 sm:$0xff]  }
  0xb8   :  { %1345 = vmatprep.subr.bf16.mxu0 %v3608_v8  ;;  %1468 = vmatprep.subr.bf16.mxu1 %v3611_v9  ;;  %v3699_v8 = vld [vmem:[%s4930_s2 + $0x1a8] ss:$16 sps:$4 sm:$0xff]   ;;  %v3704_v9 = vld [vmem:[%s4930_s2 + $0x1c4] ss:$16 sps:$4 sm:$0xff]  }
  0xbb   :  { %1346 = vmatpush1.bf16.msra.mxu0 %v3606_v10  ;;  %1469 = vmatpush1.bf16.msra.mxu1 %v3609_v11  ;;  %v3707_v10 = vld [vmem:[%s4930_s2 + $0x1cc] ss:$16 sps:$4 sm:$0xff]   ;;  %v3702_v11 = vld [vmem:[%s4930_s2 + $0x1c0] ss:$16 sps:$4 sm:$0xff]  }
  0xbc   :  { %1347 = vmatprep.subr.bf16.mxu0 %v3614_v13  ;;  %1470 = vmatprep.subr.bf16.mxu1 %v3617_v14  ;;  %v3705_v13 = vld [vmem:[%s4930_s2 + $0x1c8] ss:$16 sps:$4 sm:$0xff]   ;;  %v3710_v14 = vld [vmem:[%s4930_s2 + $0x1e4] ss:$16 sps:$4 sm:$0xff]  }
  0xbf   :  { %1348 = vmatpush1.bf16.msra.mxu0 %v3612_v15  ;;  %1471 = vmatpush1.bf16.msra.mxu1 %v3615_v16  ;;  %v3713_v15 = vld [vmem:[%s4930_s2 + $0x1ec] ss:$16 sps:$4 sm:$0xff]   ;;  %v3708_v16 = vld [vmem:[%s4930_s2 + $0x1e0] ss:$16 sps:$4 sm:$0xff]  }
  0xc0   :  { %2117 = vmatprep.subr.bf16.mxu0 %v3620_v17  ;;  %2199 = vmatprep.subr.bf16.mxu1 %v3623_v18  ;;  %v3711_v17 = vld [vmem:[%s4930_s2 + $0x1e8] ss:$16 sps:$4 sm:$0xff]   ;;  %v3716_v18 = vld [vmem:[%s4930_s2 + $0x204] ss:$16 sps:$4 sm:$0xff]  }
  0xc2   :  { %1350 = vmatmul.mubr.bf16.vlgmr.msra.gmra.mrb[0].mxu0 %v4262_v19  ;;  %1473 = vmatmul.mubr.bf16.vlgmr.msra.gmra.mrb[0].mxu1 %v4262_v19  ;;  %v3635_v19 = vld [vmem:[%s4930_s2 + $0x4c] ss:$16 sps:$4 sm:$0xff]  }
  0xc3   :  { %2118 = vmatpush1.bf16.msra.mxu0 %v3618_v20  ;;  %2200 = vmatpush1.bf16.msra.mxu1 %v3621_v21  ;;  %v3719_v20 = vld [vmem:[%s4930_s2 + $0x20c] ss:$16 sps:$4 sm:$0xff]   ;;  %v224_v21 = vsub.s32 0, %v3967_v42 }
  0xc4   :  { %2119 = vmatprep.subr.bf16.mxu0 %v3626_v22  ;;  %2201 = vmatprep.subr.bf16.mxu1 %v3629_v23  ;;  %v4649_v22 = vld [vmem:[%s4932_s4] ss:$8 sm:$0xf]  ;;  %v228_v23 = vsub.s32 1, %v3967_v42 }
  0xc7   :  { %2120 = vmatpush1.bf16.msra.mxu0 %v3624_v24  ;;  %2202 = vmatpush1.bf16.msra.mxu1 %v3627_v12  ;;  %v236_v24 = vsub.s32 3, %v3967_v42  ;;  %v225_v12 = vrot.slane %v4649_v22, %v224_v21 }
  0xc8   :  { %2121 = vmatprep.subr.bf16.mxu0 %v3632_v25  ;;  %2203 = vmatprep.subr.bf16.mxu1 %v3635_v19  ;;  %v229_v25 = vrot.slane %v4649_v22, %v228_v23 }
  0xc9   :  { %v237_v19 = vrot.slane %v4649_v22, %v236_v24 }
  0xcb   :  { %2122 = vmatpush1.bf16.msra.mxu0 %v3630_v26  ;;  %2204 = vmatpush1.bf16.msra.mxu1 %v3633_v27 }
  0xcc   :  { %2123 = vmatprep.subr.bf16.mxu0 %v3638_v28  ;;  %2205 = vmatprep.subr.bf16.mxu1 %v3641_v29 }
  0xcf   :  { %2124 = vmatpush1.bf16.msra.mxu0 %v3636_v30  ;;  %2206 = vmatpush1.bf16.msra.mxu1 %v3639_v31 }
  0xd0   :  { %2125 = vmatprep.subr.bf16.mxu0 %v3644_v32  ;;  %2207 = vmatprep.subr.bf16.mxu1 %v3647_v33 }
  0xd3   :  { %2126 = vmatpush1.bf16.msra.mxu0 %v3642_v34  ;;  %2208 = vmatpush1.bf16.msra.mxu1 %v3645_v35 }
  0xd4   :  { %2127 = vmatprep.subr.bf16.mxu0 %v3650_v36  ;;  %2209 = vmatprep.subr.bf16.mxu1 %v3653_v37 }
  0xd7   :  { %2128 = vmatpush1.bf16.msra.mxu0 %v3648_v38  ;;  %2210 = vmatpush1.bf16.msra.mxu1 %v3651_v39 }
  0xd8   :  { %2129 = vmatprep.subr.bf16.mxu0 %v3656_v40  ;;  %2211 = vmatprep.subr.bf16.mxu1 %v3659_v41  ;;  %v3714_v41 = vld [vmem:[%s4930_s2 + $0x200] ss:$16 sps:$4 sm:$0xff]  }
  0xdb   :  { %2130 = vmatpush1.bf16.msra.mxu0 %v3654_v43  ;;  %2212 = vmatpush1.bf16.msra.mxu1 %v3657_v44  ;;  %v3717_v43 = vld [vmem:[%s4930_s2 + $0x208] ss:$16 sps:$4 sm:$0xff]  }
  0xdc   :  { %2131 = vmatprep.subr.bf16.mxu0 %v3662_v45  ;;  %2213 = vmatprep.subr.bf16.mxu1 %v3665_v46  ;;  %v3722_v45 = vld [vmem:[%s4930_s2 + $0x224] ss:$16 sps:$4 sm:$0xff]   ;;  %v3725_v46 = vld [vmem:[%s4930_s2 + $0x22c] ss:$16 sps:$4 sm:$0xff]  }
  0xdf   :  { %2132 = vmatpush1.bf16.msra.mxu0 %v3660_v47  ;;  %2214 = vmatpush1.bf16.msra.mxu1 %v3663_v48  ;;  %v3720_v48 = vld [vmem:[%s4930_s2 + $0x220] ss:$16 sps:$4 sm:$0xff]  }
  0xe0   :  { %2133 = vmatprep.subr.bf16.mxu0 %v3668_v49  ;;  %2215 = vmatprep.subr.bf16.mxu1 %v3671_v50  ;;  %v3723_v49 = vld [vmem:[%s4930_s2 + $0x228] ss:$16 sps:$4 sm:$0xff]   ;;  %v3728_v50 = vld [vmem:[%s4930_s2 + $0x244] ss:$16 sps:$4 sm:$0xff]  }
  0xe3   :  { %2134 = vmatpush1.bf16.msra.mxu0 %v3666_v51  ;;  %2216 = vmatpush1.bf16.msra.mxu1 %v3669_v52  ;;  %v3731_v51 = vld [vmem:[%s4930_s2 + $0x24c] ss:$16 sps:$4 sm:$0xff]   ;;  %v3726_v52 = vld [vmem:[%s4930_s2 + $0x240] ss:$16 sps:$4 sm:$0xff]  }
  0xe4   :  { %2135 = vmatprep.subr.bf16.mxu0 %v3674_v53  ;;  %2217 = vmatprep.subr.bf16.mxu1 %v3677_v54  ;;  %v3729_v53 = vld [vmem:[%s4930_s2 + $0x248] ss:$16 sps:$4 sm:$0xff]   ;;  %v3734_v54 = vld [vmem:[%s4930_s2 + $0x264] ss:$16 sps:$4 sm:$0xff]  }
  0xe7   :  { %2136 = vmatpush1.bf16.msra.mxu0 %v3672_v55  ;;  %2218 = vmatpush1.bf16.msra.mxu1 %v3675_v56  ;;  %v3737_v55 = vld [vmem:[%s4930_s2 + $0x26c] ss:$16 sps:$4 sm:$0xff]   ;;  %v3732_v56 = vld [vmem:[%s4930_s2 + $0x260] ss:$16 sps:$4 sm:$0xff]  }
  0xe8   :  { %2137 = vmatprep.subr.bf16.mxu0 %v3680_v57  ;;  %2219 = vmatprep.subr.bf16.mxu1 %v3683_v58  ;;  %v3735_v57 = vld [vmem:[%s4930_s2 + $0x268] ss:$16 sps:$4 sm:$0xff]   ;;  %v3740_v58 = vld [vmem:[%s4930_s2 + $0x284] ss:$16 sps:$4 sm:$0xff]  }
  0xeb   :  { %2138 = vmatpush1.bf16.msra.mxu0 %v3678_v59  ;;  %2220 = vmatpush1.bf16.msra.mxu1 %v3681_v60  ;;  %v3743_v59 = vld [vmem:[%s4930_s2 + $0x28c] ss:$16 sps:$4 sm:$0xff]   ;;  %v3738_v60 = vld [vmem:[%s4930_s2 + $0x280] ss:$16 sps:$4 sm:$0xff]  }
  0xec   :  { %2139 = vmatprep.subr.bf16.mxu0 %v3686_v61  ;;  %2221 = vmatprep.subr.bf16.mxu1 %v3689_v62  ;;  %v3741_v61 = vld [vmem:[%s4930_s2 + $0x288] ss:$16 sps:$4 sm:$0xff]   ;;  %v3746_v62 = vld [vmem:[%s4930_s2 + $0x2a4] ss:$16 sps:$4 sm:$0xff]  }
  0xef   :  { %2140 = vmatpush1.bf16.msra.mxu0 %v3684_v63  ;;  %2222 = vmatpush1.bf16.msra.mxu1 %v3687_v0  ;;  %v3749_v63 = vld [vmem:[%s4930_s2 + $0x2ac] ss:$16 sps:$4 sm:$0xff]   ;;  %v3744_v0 = vld [vmem:[%s4930_s2 + $0x2a0] ss:$16 sps:$4 sm:$0xff]  }
  0xf0   :  { %2141 = vmatprep.subr.bf16.mxu0 %v3692_v1  ;;  %2223 = vmatprep.subr.bf16.mxu1 %v3695_v2  ;;  %v3747_v1 = vld [vmem:[%s4930_s2 + $0x2a8] ss:$16 sps:$4 sm:$0xff]   ;;  %v232_v2 = vsub.s32 2, %v3967_v42 }
  0xf3   :  { %2142 = vmatpush1.bf16.msra.mxu0 %v3690_v3  ;;  %2224 = vmatpush1.bf16.msra.mxu1 %v3693_v4  ;;  %v3752_v3 = vld [vmem:[%s4930_s2 + $0x2c4] ss:$16 sps:$4 sm:$0xff]   ;;  %v3755_v4 = vld [vmem:[%s4930_s2 + $0x2cc] ss:$16 sps:$4 sm:$0xff]  }
  0xf4   :  { %2143 = vmatprep.subr.bf16.mxu0 %v3698_v5  ;;  %2225 = vmatprep.subr.bf16.mxu1 %v3701_v6  ;;  %v3750_v5 = vld [vmem:[%s4930_s2 + $0x2c0] ss:$16 sps:$4 sm:$0xff]   ;;  %v3753_v6 = vld [vmem:[%s4930_s2 + $0x2c8] ss:$16 sps:$4 sm:$0xff]  }
  0xf7   :  { %2144 = vmatpush1.bf16.msra.mxu0 %v3696_v7  ;;  %2226 = vmatpush1.bf16.msra.mxu1 %v3699_v8  ;;  %v3758_v7 = vld [vmem:[%s4930_s2 + $0x2e4] ss:$16 sps:$4 sm:$0xff]   ;;  %v233_v8 = vrot.slane %v4649_v22, %v232_v2 }
  0xf8   :  { %2145 = vmatprep.subr.bf16.mxu0 %v3704_v9  ;;  %2227 = vmatprep.subr.bf16.mxu1 %v3707_v10  ;;  %v3761_v9 = vld [vmem:[%s4930_s2 + $0x2ec] ss:$16 sps:$4 sm:$0xff]   ;;  %v1585_v10 = vld [vmem:[%s4930_s2 + $0x300] sm:$0xff] }
  0xfb   :  { %2146 = vmatpush1.bf16.msra.mxu0 %v3702_v11  ;;  %2228 = vmatpush1.bf16.msra.mxu1 %v3705_v13  ;;  %v1586_v11 = vld [vmem:[%s4930_s2 + $0x308] sm:$0xff]  ;;  %v3756_v13 = vld [vmem:[%s4930_s2 + $0x2e0] ss:$16 sps:$4 sm:$0xff]  }
  0xfc   :  { %2147 = vmatprep.subr.bf16.mxu0 %v3710_v14  ;;  %2229 = vmatprep.subr.bf16.mxu1 %v3713_v15  ;;  %v3759_v14 = vld [vmem:[%s4930_s2 + $0x2e8] ss:$16 sps:$4 sm:$0xff]   ;;  %v3164_v15 = vcombine.high %v1585_v10, %v1585_v10 }
  0xff   :  { %2148 = vmatpush1.bf16.msra.mxu0 %v3708_v16  ;;  %2230 = vmatpush1.bf16.msra.mxu1 %v3711_v17  ;;  %v3166_v16 = vcombine.high %v1586_v11, %v1586_v11 }
 0x100   :  { %2158 = vmatprep.subr.bf16.mxu0 %v3716_v18  ;;  %2240 = vmatprep.subr.bf16.mxu1 %v3719_v20  ;;  %v3163_v18 = vcombine.low %v1585_v10, %v1585_v10  ;;  %v3165_v20 = vcombine.low %v1586_v11, %v1586_v11  ;;  %v3791_v10 = vld [vmem:[%s4931_s3 + $0xc8] sm:$0xff]   ;;  %v3808_v11 = vmov 0.0  }
 0x195   :  { %v1351_v26 = vpop.f32.mrb[0].mxu0  ;;  %v4662_v27 = vpop.f32.mrb[0].mxu1 }
 0x196   :  { %v3287_v28 = vadd.f32 %v1351_v26, %v225_v12  ;;  %v1353_v29 = vpop.f32.mrb[1].mxu0  ;;  %v1476_v30 = vpop.f32.mrb[1].mxu1  ;;  %v3289_v17 = vadd.f32 %v4662_v27, %v233_v8  ;;  %v2106_v12 = vsel %vm2104_vm1, %v3163_v18, 0  ;;  %v3766_v26 = vld [vmem:[%s4931_s3 + $0x80] sm:$0xff]  }
 0x197   :  { %v3288_v31 = vadd.f32 %v1353_v29, %v229_v25  ;;  %v3290_v32 = vadd.f32 %v1476_v30, %v237_v19  ;;  %v1355_v33 = vpop.f32.mrb[2].mxu0  ;;  %v1478_v34 = vpop.f32.mrb[2].mxu1  ;;  %v2112_v25 = vsel %vm2104_vm1, %v3165_v20, 0  ;;  %v3767_v19 = vld [vmem:[%s4931_s3 + $0x40] sm:$0xff]   ;;  %v3807_v29 = vmov 0   ;;  %v3770_v30 = vld [vmem:[%s4931_s3 + $0x48] sm:$0xff]  }
 0x198   :  { %v1481_v35 = vmax.f32 %v3287_v28, 0.0  ;;  %v1356_v36 = vpop.f32.mrb[3].mxu0  ;;  %v1479_v37 = vpop.f32.mrb[3].mxu1  ;;  %v1483_v22 = vmax.f32 %v3289_v17, 0.0  ;;  %v3768_v27 = vld [vmem:[%s4931_s3] sm:$0xff]   ;;  %v3773_v33 = vld [vmem:[%s4931_s3 + $0x50] sm:$0xff]  }
 0x199   :  { %v1482_v38 = vmax.f32 %v3288_v31, 0.0  ;;  %v1484_v39 = vmax.f32 %v3290_v32, 0.0  ;;  %v3769_v31 = vld [vmem:[%s4931_s3 + $0x88] sm:$0xff]   ;;  %v3772_v34 = vld [vmem:[%s4931_s3 + $0x90] sm:$0xff]   ;;  %v3776_v36 = vld [vmem:[%s4931_s3 + $0x58] sm:$0xff]  }
 0x19a   :  { %v1485_v44 = vpack.c.bf16 %v1481_v35, %v1481_v35  ;;  %v1487_v28 = vpack.c.bf16 %v1483_v22, %v1483_v22  ;;  %v3771_v32 = vld [vmem:[%s4931_s3 + $0x8] sm:$0xff]   ;;  %v3774_v35 = vld [vmem:[%s4931_s3 + $0x10] sm:$0xff]   ;;  %v3775_v37 = vld [vmem:[%s4931_s3 + $0x98] sm:$0xff]  }
 0x19b   :  { %v1486_v40 = vpack.c.bf16 %v1482_v38, %v1482_v38  ;;  %v1488_v47 = vpack.c.bf16 %v1484_v39, %v1484_v39  ;;  %v3777_v38 = vld [vmem:[%s4931_s3 + $0x18] sm:$0xff]   ;;  %v3779_v39 = vld [vmem:[%s4931_s3 + $0x60] sm:$0xff]  }
 0x19d   :  { %2149 = vmatprep.mubr.bf16.mxu0 %v1486_v40  ;;  %2231 = vmatprep.mubr.bf16.mxu1 %v1486_v40  ;;  %v3778_v40 = vld [vmem:[%s4931_s3 + $0xa0] sm:$0xff]  }
 0x19e   :  { %2150 = vmatmul.mubr.bf16.vlgmr.msra.gmra.mrb[4].mxu0 %v1485_v44  ;;  %2232 = vmatmul.mubr.bf16.vlgmr.msra.gmra.mrb[4].mxu1 %v1485_v44  ;;  %v3781_v44 = vld [vmem:[%s4931_s3 + $0xa8] sm:$0xff]  }
 0x19f   :  { %2159 = vmatpush1.bf16.msra.mxu0 %v3714_v41  ;;  %2241 = vmatpush1.bf16.msra.mxu1 %v3717_v43  ;;  %v3780_v41 = vld [vmem:[%s4931_s3 + $0x20] sm:$0xff]   ;;  %v3782_v43 = vld [vmem:[%s4931_s3 + $0x68] sm:$0xff]  }
 0x1a0   :  { %3168 = vmatprep.mubr.msk.bf16.mxu0 %vm2100_vm0, %v1488_v47  ;;  %3170 = vmatprep.mubr.msk.bf16.mxu1 %vm2100_vm0, %v1488_v47  ;;  %v3785_v47 = vld [vmem:[%s4931_s3 + $0x70] sm:$0xff]  }
 0x1a1   :  { %2160 = vmatprep.subr.bf16.mxu0 %v3722_v45  ;;  %2242 = vmatprep.subr.bf16.mxu1 %v3725_v46  ;;  %v3783_v45 = vld [vmem:[%s4931_s3 + $0x28] sm:$0xff]   ;;  %v3784_v46 = vld [vmem:[%s4931_s3 + $0xb0] sm:$0xff]  }
 0x1a3   :  { %2161 = vmatpush1.bf16.msra.mxu0 %v3720_v48  ;;  %2243 = vmatpush1.bf16.msra.mxu1 %v3723_v49  ;;  %v3786_v48 = vld [vmem:[%s4931_s3 + $0x30] sm:$0xff]   ;;  %v3787_v49 = vld [vmem:[%s4931_s3 + $0xb8] sm:$0xff]  }
 0x1a4   :  { %2162 = vmatprep.subr.bf16.mxu0 %v3728_v50  ;;  %2244 = vmatprep.subr.bf16.mxu1 %v3731_v51  ;;  %v3788_v50 = vld [vmem:[%s4931_s3 + $0x78] sm:$0xff]  }
 0x1a5   :  { %v3789_v51 = vld [vmem:[%s4931_s3 + $0x38] sm:$0xff]  }
 0x1a7   :  { %2163 = vmatpush1.bf16.msra.mxu0 %v3726_v52  ;;  %2245 = vmatpush1.bf16.msra.mxu1 %v3729_v53  ;;  %v3790_v52 = vld [vmem:[%s4931_s3 + $0xc0] sm:$0xff]  }
 0x1a8   :  { %2164 = vmatprep.subr.bf16.mxu0 %v3734_v54  ;;  %2246 = vmatprep.subr.bf16.mxu1 %v3737_v55  ;;  %v3066_v53 = vld [vmem:[%s4932_s4 + $0x1] ss:$8 sm:$0xf] }
 0x1a9   :  { %v1593_v54 = vrot.slane %v3066_v53, %v224_v21  ;;  %v1601_v55 = vrot.slane %v3066_v53, %v232_v2 }
 0x1ab   :  { %2165 = vmatpush1.bf16.msra.mxu0 %v3732_v56  ;;  %2247 = vmatpush1.bf16.msra.mxu1 %v3735_v57  ;;  %v1597_v56 = vrot.slane %v3066_v53, %v228_v23  ;;  %v1605_v57 = vrot.slane %v3066_v53, %v236_v24 }
 0x1ac   :  { %2166 = vmatprep.subr.bf16.mxu0 %v3740_v58  ;;  %2248 = vmatprep.subr.bf16.mxu1 %v3743_v59 }
 0x1af   :  { %2167 = vmatpush1.bf16.msra.mxu0 %v3738_v60  ;;  %2249 = vmatpush1.bf16.msra.mxu1 %v3741_v61 }
 0x1b0   :  { %2168 = vmatprep.subr.bf16.mxu0 %v3746_v62  ;;  %2250 = vmatprep.subr.bf16.mxu1 %v3749_v63 }
 0x1b3   :  { %2169 = vmatpush1.bf16.msra.mxu0 %v3744_v0  ;;  %2251 = vmatpush1.bf16.msra.mxu1 %v3747_v1 }
 0x1b4   :  { %2170 = vmatprep.subr.bf16.mxu0 %v3752_v3  ;;  %2252 = vmatprep.subr.bf16.mxu1 %v3755_v4 }
 0x1b7   :  { %2171 = vmatpush1.bf16.msra.mxu0 %v3750_v5  ;;  %2253 = vmatpush1.bf16.msra.mxu1 %v3753_v6 }
 0x1b8   :  { %2172 = vmatprep.subr.bf16.mxu0 %v3758_v7  ;;  %2254 = vmatprep.subr.bf16.mxu1 %v3761_v9 }
 0x1bb   :  { %2173 = vmatpush1.bf16.msra.mxu0 %v3756_v13  ;;  %2255 = vmatpush1.bf16.msra.mxu1 %v3759_v14  ;;  %v3792_v13 = vld [vmem:[%s4931_s3 + $0xd0] sm:$0xff]  }
 0x1bc   :  { %3167 = vmatprep.subr.msk.bf16.mxu0 %vm2104_vm1, %v3164_v15  ;;  %3169 = vmatprep.subr.msk.bf16.mxu1 %vm2104_vm1, %v3166_v16  ;;  %v2339_v16 = vld [vmem:[%s4932_s4 + $0x2] ss:$0 sm:$0xff] }
 0x1bf   :  { %2175 = vmatpush1.bf16.msra.mxu0 %v2106_v12  ;;  %2257 = vmatpush1.bf16.msra.mxu1 %v2112_v25 }
 0x1c0   :  { %2534 = vmatprep.subr.bf16.mxu1 %v3807_v29  ;;  %3212 = vmatprep.subr.bf16.mxu0 %v3767_v19 }
 0x1c2   :  { %2191 = vmatmul.mubr.bf16.vlgmr.msra.gmra.mrb[4].mxu0 %v1487_v28  ;;  %2273 = vmatmul.mubr.bf16.vlgmr.msra.gmra.mrb[4].mxu1 %v1487_v28 }
 0x1c3   :  { %2535 = vmatpush1.bf16.msra.mxu1 %v3766_v26  ;;  %3213 = vmatpush3.bf16.msra.mxu0 %v3768_v27 }
 0x1c4   :  { %2536 = vmatprep.subr.bf16.mxu1 %v3807_v29  ;;  %3214 = vmatprep.subr.bf16.mxu0 %v3770_v30  ;;  %v3793_v30 = vld [vmem:[%s4931_s3 + $0xf8] sm:$0xff]  }
 0x1c7   :  { %2537 = vmatpush1.bf16.msra.mxu1 %v3769_v31  ;;  %3215 = vmatpush3.bf16.msra.mxu0 %v3771_v32  ;;  %v3794_v31 = vld [vmem:[%s4931_s3 + $0x100] sm:$0xff]   ;;  %v3795_v32 = vld [vmem:[%s4931_s3 + $0xd8] sm:$0xff]  }
 0x1c8   :  { %2538 = vmatprep.subr.bf16.mxu1 %v3807_v29  ;;  %3216 = vmatprep.subr.bf16.mxu0 %v3773_v33  ;;  %v3796_v33 = vld [vmem:[%s4931_s3 + $0x108] sm:$0xff]  }
 0x1cb   :  { %2539 = vmatpush1.bf16.msra.mxu1 %v3772_v34  ;;  %3217 = vmatpush3.bf16.msra.mxu0 %v3774_v35  ;;  %v3797_v34 = vld [vmem:[%s4931_s3 + $0xe0] sm:$0xff]   ;;  %v3798_v35 = vld [vmem:[%s4931_s3 + $0x110] sm:$0xff]  }
 0x1cc   :  { %2540 = vmatprep.subr.bf16.mxu1 %v3807_v29  ;;  %3218 = vmatprep.subr.bf16.mxu0 %v3776_v36  ;;  %v3800_v36 = vld [vmem:[%s4931_s3 + $0x118] ss:$0 sps:$4 sm:$0x11]  }
 0x1cf   :  { %2541 = vmatpush1.bf16.msra.mxu1 %v3775_v37  ;;  %3219 = vmatpush3.bf16.msra.mxu0 %v3777_v38  ;;  %v2685_v37 = vsel %vm2683_vm5, %v3800_v36, 0  ;;  %v2640_v38 = vld [vmem:[%s4933_s5] sm:$0x3] }
 0x1d0   :  { %2542 = vmatprep.subr.bf16.mxu1 %v3807_v29  ;;  %3220 = vmatprep.subr.bf16.mxu0 %v3779_v39  ;;  %v2641_v39 = vpack.c.bf16 %v2640_v38, %v2640_v38 }
 0x1d3   :  { %2543 = vmatpush1.bf16.msra.mxu1 %v3778_v40  ;;  %3221 = vmatpush3.bf16.msra.mxu0 %v3780_v41  ;;  %v2580_v40 = vld [vmem:[%s4932_s4 + $0x3] ss:$0 sm:$0xff] }
 0x1d4   :  { %2544 = vmatprep.subr.bf16.mxu1 %v3807_v29  ;;  %3222 = vmatprep.subr.bf16.mxu0 %v3782_v43 }
 0x1d7   :  { %2545 = vmatpush1.bf16.msra.mxu1 %v3781_v44  ;;  %3223 = vmatpush3.bf16.msra.mxu0 %v3783_v45 }
 0x1d8   :  { %2546 = vmatprep.subr.bf16.mxu1 %v3807_v29  ;;  %3224 = vmatprep.subr.bf16.mxu0 %v3785_v47 }
 0x1db   :  { %2547 = vmatpush1.bf16.msra.mxu1 %v3784_v46  ;;  %3225 = vmatpush3.bf16.msra.mxu0 %v3786_v48 }
 0x1dc   :  { %2548 = vmatprep.subr.bf16.mxu1 %v3807_v29  ;;  %3226 = vmatprep.subr.bf16.mxu0 %v3788_v50 }
 0x1df   :  { %2549 = vmatpush1.bf16.msra.mxu1 %v3787_v49  ;;  %3227 = vmatpush3.bf16.msra.mxu0 %v3789_v51  ;;  %v3799_v49 = vld [vmem:[%s4931_s3 + $0xe8] sm:$0xff]   ;;  %v3801_v51 = vld [vmem:[%s4931_s3 + $0xf0] sm:$0xff]  }
 0x1e0   :  { %2550 = vmatprep.subr.bf16.mxu1 %v3807_v29  ;;  %3249 = vmatprep.subr.bf16.mxu0 %v3808_v11 }
 0x1e3   :  { %2551 = vmatpush1.bf16.msra.mxu1 %v3790_v52 }
 0x1e4   :  { %3271 = vmatprep.subr.bf16.mxu1 %v3808_v11 }
 0x295   :  { %v2192_v58 = vpop.f32.mrb[4].mxu0  ;;  %v2274_v59 = vpop.f32.mrb[4].mxu1 }
 0x296   :  { %v3291_v60 = vadd.f32 %v2192_v58, %v1593_v54  ;;  %v3293_v61 = vadd.f32 %v2274_v59, %v1601_v55  ;;  %v2194_v62 = vpop.f32.mrb[5].mxu0  ;;  %v2276_v63 = vpop.f32.mrb[5].mxu1  ;;  %v2651_v58 = vld [vmem:[%s4932_s4 + $0x4] ss:$0 sm:$0xff] }
 0x297   :  { %v3292_v0 = vadd.f32 %v2194_v62, %v1597_v56  ;;  %v3294_v1 = vadd.f32 %v2276_v63, %v1605_v57  ;;  %v2196_v3 = vpop.f32.mrb[6].mxu0  ;;  %v2278_v4 = vpop.f32.mrb[6].mxu1 }
 0x298   :  { %v2281_v21 = vmax.f32 %v3291_v60, 0.0  ;;  %v2283_v5 = vmax.f32 %v3293_v61, 0.0  ;;  %v2197_v6 = vpop.f32.mrb[7].mxu0  ;;  %v2279_v2 = vpop.f32.mrb[7].mxu1 }
 0x299   :  { %v2282_v7 = vmax.f32 %v3292_v0, 0.0  ;;  %v2284_v8 = vmax.f32 %v3294_v1, 0.0 }
 0x29a   :  { %v2285_v24 = vpack.c.bf16 %v2281_v21, %v2281_v21  ;;  %v2287_v9 = vpack.c.bf16 %v2283_v5, %v2283_v5 }
 0x29b   :  { %v2286_v23 = vpack.c.bf16 %v2282_v7, %v2282_v7  ;;  %v2288_v42 = vpack.c.bf16 %v2284_v8, %v2284_v8 }
 0x29d   :  { %2526 = vmatprep.mubr.bf16.mxu0 %v2286_v23  ;;  %3196 = vmatprep.mubr.msk.bf16.mxu1 %vm2490_vm2, %v2288_v42 }
 0x29e   :  { %2527 = vmatmul.mubr.bf16.vlgmr.msra.gmra.mrb[8].mxu0 %v2285_v24  ;;  %2567 = vmatmul.mubr.bf16.vlgmr.msra.gmra.mrb[8].mxu1 %v2287_v9 }
 0x29f   :  { %3250 = vmatpush3.bf16.msra.mxu0 %v3791_v10  ;;  %3253 = vmatprep.mubr.msk.bf16.mxu0 %vm3809_vm3, %v3808_v11 }
 0x2a0   :  { %3251 = vmatprep.subr.bf16.mxu0 %v3808_v11  ;;  %3275 = vmatprep.mubr.msk.bf16.mxu1 %vm3809_vm3, %v3808_v11 }
 0x2a1   :  { %3272 = vmatpush3.bf16.msra.mxu1 %v3795_v32 }
 0x2a2   :  { %3273 = vmatprep.subr.bf16.mxu1 %v3808_v11 }
 0x2a3   :  { %3252 = vmatpush3.bf16.msra.mxu0 %v3792_v13 }
 0x2a4   :  { %3257 = vmatprep.subr.bf16.mxu0 %v3808_v11 }
 0x2a5   :  { %3274 = vmatpush3.bf16.msra.mxu1 %v3797_v34 }
 0x2a6   :  { %3279 = vmatprep.subr.bf16.mxu1 %v3808_v11 }
 0x371   :  { %v3228_v14 = vpop.f32.mrb[8].mxu0  ;;  %v2568_v15 = vpop.f32.mrb[8].mxu1 }
 0x372   :  { %v3229_v17 = vpop.f32.mrb[9].mxu0  ;;  %v2570_v18 = vpop.f32.mrb[9].mxu1 }
 0x373   :  { %v3230_v20 = vadd.f32 %v3229_v17, %v3228_v14  ;;  %v3231_v22 = vpop.f32.mrb[10].mxu0  ;;  %v2571_v12 = vpop.f32.mrb[10].mxu1 }
 0x374   :  { %v3232_v25 = vpop.f32.mrb[11].mxu0  ;;  %v2572_v19 = vpop.f32.mrb[11].mxu1 }
 0x375   :  { %v2529_v26 = vadd.f32 %v3230_v20, %v2339_v16 }
 0x377   :  { %v2569_v27 = vadd.f32 %v2568_v15, %v2529_v26 }
 0x379   :  { %v2574_v28 = vmax.f32 %v2569_v27, 0.0 }
 0x37b   :  { %v2575_v29 = vpack.c.bf16 %v2574_v28, %v2574_v28 }
 0x37d   :  { %3254 = vmatmul.mubr.msk.bf16.vlgmr.msra.gmra.mrb[12].mxu0 %vm2593_vm4, %v2575_v29 }
 0x37e   :  { %3267 = vmatprep.mubr.msk.bf16.mxu0 %vm3809_vm3, %v3808_v11  ;;  %3258 = vmatpush3.bf16.msra.mxu0 %v3793_v30 }
 0x37f   :  { %3259 = vmatprep.subr.bf16.mxu0 %v3808_v11 }
 0x382   :  { %3260 = vmatpush3.bf16.msra.mxu0 %v3794_v31 }
 0x383   :  { %3261 = vmatprep.subr.bf16.mxu0 %v3808_v11 }
 0x386   :  { %3262 = vmatpush3.bf16.msra.mxu0 %v3796_v33 }
 0x387   :  { %3263 = vmatprep.subr.bf16.mxu0 %v3808_v11 }
 0x38a   :  { %3264 = vmatpush3.bf16.msra.mxu0 %v3798_v35 }
 0x38b   :  { %3265 = vmatprep.subr.bf16.mxu0 %v3808_v11 }
 0x38e   :  { %3266 = vmatpush3.bf16.msra.mxu0 %v2685_v37 }
 0x391   :  { %3268 = vmatmul.mubr.msk.bf16.vlgmr.msra.gmra.mrb[16].mxu0 %vm2679_vm6, %v2641_v39 }
 0x450   :  { %v2631_v41 = vpop.f32.mrb[12].mxu0 }
 0x451   :  { %v2632_v43 = vadd.f32 %v2631_v41, %v2580_v40  ;;  %v3255_v44 = vpop.f32.mrb[13].mxu0 }
 0x452   :  { %v2634_v45 = vpop.f32.mrb[14].mxu0 }
 0x453   :  { %v2637_v46 = vmax.f32 %v2632_v43, 0.0  ;;  %v3256_v47 = vpop.f32.mrb[15].mxu0 }
 0x455   :  { %2639 = vst.msk [vmem:[#allocation2] sm:$0xf] %vm2638_vm7, %v2637_v46 }
 0x45c   :  { %v2727_v48 = vld [vmem:[#allocation2] sm:$0x3]  ;;  %v2789_v52 = vld [vmem:[#allocation2 + $0x2] sm:$0x3] }
 0x45d   :  { %v2728_v50 = vpack.c.bf16 %v2727_v48, %v2727_v48  ;;  %v2790_v53 = vpack.c.bf16 %v2789_v52, %v2789_v52 }
 0x45f   :  { %3276 = vmatmul.mubr.msk.bf16.vlgmr.msra.gmra.mrb[12].mxu1 %vm2593_vm4, %v2728_v50 }
 0x460   :  { %3280 = vmatpush3.bf16.msra.mxu1 %v3799_v49  ;;  %3283 = vmatprep.mubr.msk.bf16.mxu1 %vm3809_vm3, %v3808_v11 }
 0x461   :  { %3281 = vmatprep.subr.bf16.mxu1 %v3808_v11 }
 0x464   :  { %3282 = vmatpush3.bf16.msra.mxu1 %v3801_v51  ;;  %v2721_v54 = vpop.f32.mrb[16].mxu0 }
 0x465   :  { %v3269_v55 = vpop.f32.mrb[17].mxu0  ;;  %v2722_v59 = vadd.f32 %v2721_v54, %v2651_v58 }
 0x466   :  { %v2724_v56 = vpop.f32.mrb[18].mxu0 }
 0x467   :  { %v3270_v57 = vpop.f32.mrb[19].mxu0 }
 0x46b   :  { %3284 = vmatmul.mubr.msk.bf16.vlgmr.msra.gmra.mrb[12].mxu1 %vm2593_vm4, %v2790_v53 }
 0x53e   :  { %v2844_v60 = vpop.f32.mrb[12].mxu1 }
 0x53f   :  { %v3296_v61 = vadd.f32 %v2844_v60, %v2722_v59  ;;  %v3285_v62 = vpop.f32.mrb[13].mxu1 }
 0x540   :  { %v2847_v63 = vpop.f32.mrb[14].mxu1 }
 0x541   :  { %v3286_v0 = vpop.f32.mrb[15].mxu1  ;;  %v2853_v1 = vsel %vm2851_vm8, %v3296_v61, -inf  ;;  %2852 = vst.msk [vmem:[%s4934_s6] sm:$0x3] %vm2851_vm8, %v3296_v61 }
 0x542   :  { %2854 = vmax.xlane.f32.xlu0 %v2853_v1 }
 0x5cf   :  { %v2855_v3 = vpop.xlane.xlu0 %2854 }
 0x5d0   :  { %v2856_v4 = vsub.f32 %v3296_v61, %v2855_v3 }
 0x5d2   :  { %v2857_v21 = vmul.f32 1.442695, %v2856_v4 }
 0x5d4   :  { %3802 = vpow2.f32 %v2857_v21 }
 0x5de   :  { %v3803_v5 = vpop.eup %3802 }
 0x5df   :  { %v2859_v6 = vsel %vm2851_vm8, %v3803_v5, 0.0 }
 0x5e0   :  { %2860 = vadd.xlane.f32.xlu0 %v2859_v6 }
 0x66d   :  { %v2861_v2 = vpop.xlane.xlu0 %2860 }
 0x66e   :  { %3804 = vrcp.f32 %v2861_v2 }
 0x678   :  { %v3805_v7 = vpop.eup %3804 }
 0x679   :  { %v2863_v8 = vmul.f32 %v3805_v7, %v3803_v5 }
 0x67b   :  { %2864 = vst.msk [vmem:[%s4935_s7] sm:$0x3] %vm2851_vm8, %v2863_v8 }

</bundles_post_ra>
